<compile_context>
chip_gen: v7x
topology: tpu7x:2x2x1
jax: 0.10.0
libtpu: 0.0.40
codegen_flags: <defaults>
</compile_context>

<pallas_src>
import functools

import jax
import jax.numpy as jnp
from jax.experimental import pallas as pl
from jax.experimental.pallas import tpu as pltpu


def _round_up(n, m):
    return ((n + m - 1) // m) * m


def _pad2(a, shape):
    return jnp.pad(a, [(0, shape[0] - a.shape[0]), (0, shape[1] - a.shape[1])])


def _pad1(a, n):
    return jnp.pad(a, (0, n - a.shape[0]))


def _make_rnn_kernel(num_layers, seq_len, horizon):
    """Builds the Pallas kernel body for a static configuration."""
    tail_start = seq_len - horizon

    def kernel(*refs):
        # ref layout:
        #   refs[0]                         : pre0_ref  (T, Bt, H)  layer-0 pre-activations
        #   refs[1]                         : w_hh0_T   (H, H)
        #   refs[2 + 3*(l-1) + 0..2], l>=1  : w_ih_T_l (H,H), w_hh_T_l (H,H), bias_l (1,H)
        #   refs[2 + 3*(L-1) + 0]           : w_out_T   (H, O)
        #   refs[2 + 3*(L-1) + 1]           : b_out     (1, O)
        #   refs[2 + 3*(L-1) + 2]           : out_ref   (horizon, Bt, O)
        #   refs[2 + 3*(L-1) + 3]           : seq_ref   (T, Bt, H) VMEM scratch
        pre0_ref = refs[0]
        w_hh0_ref = refs[1]
        n_deep = 3 * (num_layers - 1)
        deep_refs = refs[2:2 + n_deep]
        w_out_ref = refs[2 + n_deep]
        b_out_ref = refs[3 + n_deep]
        out_ref = refs[4 + n_deep]
        seq_ref = refs[5 + n_deep]

        _, B, H = seq_ref.shape

        def recurrence(pre_ref, w_hh_ref, is_last):
            # h_t = tanh(pre[t] + h_{t-1} @ W_hh^T)  -- single dot per step.
            # W_hh is kept as a ref operand (no vreg hoist) to avoid register
            # pressure / spills as H grows.
            def step(t, h):
                h_new = jnp.tanh(
                    pre_ref[t]
                    + jnp.dot(h, w_hh_ref[...], preferred_element_type=jnp.float32)
                )
                if is_last:
                    # Only the tail is consumed by the linear head.
                    @pl.when(t >= tail_start)
                    def _():
                        seq_ref[t] = h_new
                else:
                    seq_ref[t] = h_new
                return h_new

            h0 = jnp.zeros((B, H), jnp.float32)
            jax.lax.fori_loop(0, seq_len, step, h0, unroll=True)

        # ---- layer 0 (input projection was hoisted out of the kernel) ----
        recurrence(pre0_ref, w_hh0_ref, is_last=(num_layers == 1))

        # ---- layers 1 .. L-1 ----
        for l in range(1, num_layers):
            w_ih_ref, w_hh_ref, bias_ref = deep_refs[3 * (l - 1): 3 * (l - 1) + 3]
            # Bulk input projection for the whole sequence as ONE MXU matmul,
            # written back into seq_ref in place (value is read before the store).
            prev = seq_ref[...].reshape(seq_len * B, H)
            pre = (
                jnp.dot(prev, w_ih_ref[...], preferred_element_type=jnp.float32)
                + bias_ref[...]
            )
            seq_ref[...] = pre.reshape(seq_len, B, H)
            recurrence(seq_ref, w_hh_ref, is_last=(l == num_layers - 1))

        # ---- linear head on the last `horizon` timesteps (lane-dense output) ----
        tail = seq_ref[tail_start:seq_len]               # (horizon, B, H) static slice
        flat = tail.reshape(horizon * B, H)
        y = (
            jnp.dot(flat, w_out_ref[...], preferred_element_type=jnp.float32)
            + b_out_ref[...]
        )
        out_ref[...] = y.reshape(horizon, B, -1)

    return kernel


def rnn_model_forward(x, params, *, hidden_dim, num_layers, horizon):
    """Pallas forward. x: (B, T, input_dim) float32 -> (B, horizon, output_dim)."""
    B, T, in_dim = x.shape
    out_dim = params["w_out"].shape[0]
    assert horizon <= T, "horizon must be <= window size"

    f32 = jnp.float32
    H_pad = _round_up(hidden_dim, 128)
    O_pad = _round_up(out_dim, 128)

    # Batch padding / tiling to (8, 128) vreg geometry.
    B_pad8 = _round_up(max(B, 1), 8)
    if B_pad8 <= 256:
        B_tile = B_pad8
        B_pad = B_pad8
    else:
        B_tile = 256
        B_pad = _round_up(B, B_tile)
    grid = (B_pad // B_tile,)

    x_pad = jnp.zeros((B_pad, T, in_dim), f32).at[:B].set(x.astype(f32))

    # Layer-0 input projection + combined bias done in plain XLA (one big,
    # parallel matmul); result fed time-major to the kernel.
    w_ih0_T = _pad2(params["w_ih_0"].T.astype(f32), (in_dim, H_pad))
    bias0 = _pad1((params["b_ih_0"] + params["b_hh_0"]).astype(f32), H_pad)
    pre0 = jnp.einsum("btf,fh->tbh", x_pad, w_ih0_T) + bias0      # (T, B_pad, H_pad)

    inputs = [pre0, _pad2(params["w_hh_0"].T.astype(f32), (H_pad, H_pad))]
    in_specs = [
        pl.BlockSpec((T, B_tile, H_pad), lambda b: (0, b, 0)),
        pl.BlockSpec((H_pad, H_pad), lambda b: (0, 0)),
    ]
    for l in range(1, num_layers):
        inputs.append(_pad2(params[f"w_ih_{l}"].T.astype(f32), (H_pad, H_pad)))
        inputs.append(_pad2(params[f"w_hh_{l}"].T.astype(f32), (H_pad, H_pad)))
        inputs.append(
            _pad2(
                (params[f"b_ih_{l}"] + params[f"b_hh_{l}"]).reshape(1, -1).astype(f32),
                (1, H_pad),
            )
        )
        in_specs += [
            pl.BlockSpec((H_pad, H_pad), lambda b: (0, 0)),
            pl.BlockSpec((H_pad, H_pad), lambda b: (0, 0)),
            pl.BlockSpec((1, H_pad), lambda b: (0, 0)),
        ]
    inputs.append(_pad2(params["w_out"].T.astype(f32), (H_pad, O_pad)))
    inputs.append(_pad2(params["b_out"].reshape(1, -1).astype(f32), (1, O_pad)))
    in_specs += [
        pl.BlockSpec((H_pad, O_pad), lambda b: (0, 0)),
        pl.BlockSpec((1, O_pad), lambda b: (0, 0)),
    ]

    out_tm = pl.pallas_call(
        _make_rnn_kernel(num_layers, T, horizon),
        out_shape=jax.ShapeDtypeStruct((horizon, B_pad, O_pad), f32),
        grid=grid,
        in_specs=in_specs,
        out_specs=pl.BlockSpec((horizon, B_tile, O_pad), lambda b: (0, b, 0)),
        scratch_shapes=[pltpu.VMEM((T, B_tile, H_pad), f32)],
        compiler_params=pltpu.CompilerParams(dimension_semantics=("parallel",)),
    )(*inputs)

    # TODO(synk): at very large hidden_dim (>=256) cast MXU operands to bf16
    # (keeping f32 accumulation) on v6e/v7x; kept f32 here to match the
    # PyTorch reference bit-for-bit within 1e-5.

    out = jnp.transpose(out_tm, (1, 0, 2))                # (B_pad, horizon, O_pad)
    return out[:B, :, :out_dim]


def rnn_model_reference(x, params, *, num_layers, horizon):
    """Pure-JAX reference of the PyTorch module (for verification)."""
    B = x.shape[0]
    h_seq = x.astype(jnp.float32)
    for l in range(num_layers):
        w_ih = params[f"w_ih_{l}"]
        w_hh = params[f"w_hh_{l}"]
        bias = params[f"b_ih_{l}"] + params[f"b_hh_{l}"]
        H = w_hh.shape[0]

        def step(h, x_t, w_ih=w_ih, w_hh=w_hh, bias=bias):
            h_new = jnp.tanh(x_t @ w_ih.T + h @ w_hh.T + bias)
            return h_new, h_new

        h0 = jnp.zeros((B, H), jnp.float32)
        _, outs = jax.lax.scan(step, h0, jnp.transpose(h_seq, (1, 0, 2)))
        h_seq = jnp.transpose(outs, (1, 0, 2))
    tail = h_seq[:, -horizon:, :]
    return tail @ params["w_out"].T + params["b_out"]


def init_params(key, input_dim, hidden_dim, output_dim, num_layers):
    """Deterministic init mimicking torch's U(-1/sqrt(H), 1/sqrt(H))."""
    params = {}
    k = 1.0 / jnp.sqrt(jnp.float32(hidden_dim))
    for l in range(num_layers):
        din = input_dim if l == 0 else hidden_dim
        key, k1, k2, k3, k4 = jax.random.split(key, 5)
        params[f"w_ih_{l}"] = jax.random.uniform(k1, (hidden_dim, din), jnp.float32, -k, k)
        params[f"w_hh_{l}"] = jax.random.uniform(k2, (hidden_dim, hidden_dim), jnp.float32, -k, k)
        params[f"b_ih_{l}"] = jax.random.uniform(k3, (hidden_dim,), jnp.float32, -k, k)
        params[f"b_hh_{l}"] = jax.random.uniform(k4, (hidden_dim,), jnp.float32, -k, k)
    key, k5, k6 = jax.random.split(key, 3)
    params["w_out"] = jax.random.uniform(k5, (output_dim, hidden_dim), jnp.float32, -k, k)
    params["b_out"] = jax.random.uniform(k6, (output_dim,), jnp.float32, -k, k)
    return params


if __name__ == "__main__":
    # Small shapes consistent with the module's forward:
    # X: (batch_size, window_size, number_of_features)
    batch, window, input_dim = 2, 8, 4
    hidden_dim, output_dim, num_layers, horizon = 32, 3, 2, 4

    key = jax.random.PRNGKey(0)
    key, xkey = jax.random.split(key)
    x = jax.random.normal(xkey, (batch, window, input_dim), jnp.float32)
    params = init_params(key, input_dim, hidden_dim, output_dim, num_layers)

    fwd = jax.jit(
        functools.partial(
            rnn_model_forward,
            hidden_dim=hidden_dim,
            num_layers=num_layers,
            horizon=horizon,
        )
    )
    out = fwd(x, params)
    jax.block_until_ready(out)

    ref = rnn_model_reference(x, params, num_layers=num_layers, horizon=horizon)
    assert out.shape == (batch, horizon, output_dim), out.shape
    assert jnp.allclose(out, ref, atol=1e-5, rtol=1e-5), (
        f"max abs diff = {jnp.max(jnp.abs(out - ref))}"
    )
    print("KERNEL_OK")
</pallas_src>

<mosaic_0001>
module attributes {stable_mosaic.version = 11 : i64} {
  func.func @kernel(%arg0: i32, %arg1: memref<8x8x128xf32, #tpu.memory_space<vmem>>, %arg2: memref<128x128xf32, #tpu.memory_space<vmem>>, %arg3: memref<128x128xf32, #tpu.memory_space<vmem>>, %arg4: memref<128x128xf32, #tpu.memory_space<vmem>>, %arg5: memref<1x128xf32, #tpu.memory_space<vmem>>, %arg6: memref<128x128xf32, #tpu.memory_space<vmem>>, %arg7: memref<1x128xf32, #tpu.memory_space<vmem>>, %arg8: memref<4x8x128xf32, #tpu.memory_space<vmem>>, %arg9: memref<8x8x128xf32, #tpu.memory_space<vmem>>) attributes {dimension_semantics = [#tpu.dimension_semantics<parallel>], iteration_bounds = array<i64: 1>, scalar_prefetch = 0 : i64, scratch_operands = 1 : i64, tpu.core_type = #tpu.core_type<tc>, window_params = [{transform_indices = @transform_0, window_bounds = array<i64: 8, 8, 128>}, {pipeline_mode = #tpu.pipeline_mode<synchronous>, transform_indices = @transform_1, window_bounds = array<i64: 128, 128>}, {pipeline_mode = #tpu.pipeline_mode<synchronous>, transform_indices = @transform_2, window_bounds = array<i64: 128, 128>}, {pipeline_mode = #tpu.pipeline_mode<synchronous>, transform_indices = @transform_3, window_bounds = array<i64: 128, 128>}, {pipeline_mode = #tpu.pipeline_mode<synchronous>, transform_indices = @transform_4, window_bounds = array<i64: 1, 128>}, {pipeline_mode = #tpu.pipeline_mode<synchronous>, transform_indices = @transform_5, window_bounds = array<i64: 128, 128>}, {pipeline_mode = #tpu.pipeline_mode<synchronous>, transform_indices = @transform_6, window_bounds = array<i64: 1, 128>}, {transform_indices = @transform_7, window_bounds = array<i64: 4, 8, 128>}]} {
    %cst = arith.constant 0.000000e+00 : f32
    %0 = vector.broadcast %cst : f32 to vector<8x128xf32>
    %c0_i32 = arith.constant 0 : i32
    %1 = arith.index_cast %c0_i32 : i32 to index
    %c0 = arith.constant 0 : index
    %c0_0 = arith.constant 0 : index
    %2 = vector.load %arg1[%1, %c0, %c0_0] : memref<8x8x128xf32, #tpu.memory_space<vmem>>, vector<1x8x128xf32>
    %3 = vector.shape_cast %2 : vector<1x8x128xf32> to vector<8x128xf32>
    %c0_1 = arith.constant 0 : index
    %c0_2 = arith.constant 0 : index
    %4 = vector.load %arg2[%c0_1, %c0_2] : memref<128x128xf32, #tpu.memory_space<vmem>>, vector<128x128xf32>
    %cst_3 = arith.constant dense<0.000000e+00> : vector<8x128xf32>
    %5 = tpu.matmul %0, %4, %cst_3 {dimension_numbers = #tpu.dot_dimension_numbers<[1], [0], [0], [1], [0, 0, 1, 1], [], []>} : vector<8x128xf32>, vector<128x128xf32>, vector<8x128xf32> -> vector<8x128xf32>
    %6 = arith.addf %3, %5 : vector<8x128xf32>
    %7 = math.tanh %6 : vector<8x128xf32>
    %8 = arith.index_cast %c0_i32 : i32 to index
    %c0_4 = arith.constant 0 : index
    %c0_5 = arith.constant 0 : index
    %9 = vector.load %arg9[%8, %c0_4, %c0_5] : memref<8x8x128xf32, #tpu.memory_space<vmem>>, vector<1x8x128xf32>
    %10 = vector.shape_cast %9 : vector<1x8x128xf32> to vector<8x128xf32>
    %11 = vector.shape_cast %7 : vector<8x128xf32> to vector<1x8x128xf32>
    tpu.vector_store %arg9[%8, %c0_4, %c0_5], %11 {strides = array<i32>} : memref<8x8x128xf32, #tpu.memory_space<vmem>>, vector<1x8x128xf32>,
    %c1_i32 = arith.constant 1 : i32
    %12 = arith.index_cast %c1_i32 : i32 to index
    %c0_6 = arith.constant 0 : index
    %c0_7 = arith.constant 0 : index
    %13 = vector.load %arg1[%12, %c0_6, %c0_7] : memref<8x8x128xf32, #tpu.memory_space<vmem>>, vector<1x8x128xf32>
    %14 = vector.shape_cast %13 : vector<1x8x128xf32> to vector<8x128xf32>
    %c0_8 = arith.constant 0 : index
    %c0_9 = arith.constant 0 : index
    %15 = vector.load %arg2[%c0_8, %c0_9] : memref<128x128xf32, #tpu.memory_space<vmem>>, vector<128x128xf32>
    %cst_10 = arith.constant dense<0.000000e+00> : vector<8x128xf32>
    %16 = tpu.matmul %7, %15, %cst_10 {dimension_numbers = #tpu.dot_dimension_numbers<[1], [0], [0], [1], [0, 0, 1, 1], [], []>} : vector<8x128xf32>, vector<128x128xf32>, vector<8x128xf32> -> vector<8x128xf32>
    %17 = arith.addf %14, %16 : vector<8x128xf32>
    %18 = math.tanh %17 : vector<8x128xf32>
    %19 = arith.index_cast %c1_i32 : i32 to index
    %c0_11 = arith.constant 0 : index
    %c0_12 = arith.constant 0 : index
    %20 = vector.load %arg9[%19, %c0_11, %c0_12] : memref<8x8x128xf32, #tpu.memory_space<vmem>>, vector<1x8x128xf32>
    %21 = vector.shape_cast %20 : vector<1x8x128xf32> to vector<8x128xf32>
    %22 = vector.shape_cast %18 : vector<8x128xf32> to vector<1x8x128xf32>
    tpu.vector_store %arg9[%19, %c0_11, %c0_12], %22 {strides = array<i32>} : memref<8x8x128xf32, #tpu.memory_space<vmem>>, vector<1x8x128xf32>,
    %c2_i32 = arith.constant 2 : i32
    %23 = arith.index_cast %c2_i32 : i32 to index
    %c0_13 = arith.constant 0 : index
    %c0_14 = arith.constant 0 : index
    %24 = vector.load %arg1[%23, %c0_13, %c0_14] : memref<8x8x128xf32, #tpu.memory_space<vmem>>, vector<1x8x128xf32>
    %25 = vector.shape_cast %24 : vector<1x8x128xf32> to vector<8x128xf32>
    %c0_15 = arith.constant 0 : index
    %c0_16 = arith.constant 0 : index
    %26 = vector.load %arg2[%c0_15, %c0_16] : memref<128x128xf32, #tpu.memory_space<vmem>>, vector<128x128xf32>
    %cst_17 = arith.constant dense<0.000000e+00> : vector<8x128xf32>
    %27 = tpu.matmul %18, %26, %cst_17 {dimension_numbers = #tpu.dot_dimension_numbers<[1], [0], [0], [1], [0, 0, 1, 1], [], []>} : vector<8x128xf32>, vector<128x128xf32>, vector<8x128xf32> -> vector<8x128xf32>
    %28 = arith.addf %25, %27 : vector<8x128xf32>
    %29 = math.tanh %28 : vector<8x128xf32>
    %30 = arith.index_cast %c2_i32 : i32 to index
    %c0_18 = arith.constant 0 : index
    %c0_19 = arith.constant 0 : index
    %31 = vector.load %arg9[%30, %c0_18, %c0_19] : memref<8x8x128xf32, #tpu.memory_space<vmem>>, vector<1x8x128xf32>
    %32 = vector.shape_cast %31 : vector<1x8x128xf32> to vector<8x128xf32>
    %33 = vector.shape_cast %29 : vector<8x128xf32> to vector<1x8x128xf32>
    tpu.vector_store %arg9[%30, %c0_18, %c0_19], %33 {strides = array<i32>} : memref<8x8x128xf32, #tpu.memory_space<vmem>>, vector<1x8x128xf32>,
    %c3_i32 = arith.constant 3 : i32
    %34 = arith.index_cast %c3_i32 : i32 to index
    %c0_20 = arith.constant 0 : index
    %c0_21 = arith.constant 0 : index
    %35 = vector.load %arg1[%34, %c0_20, %c0_21] : memref<8x8x128xf32, #tpu.memory_space<vmem>>, vector<1x8x128xf32>
    %36 = vector.shape_cast %35 : vector<1x8x128xf32> to vector<8x128xf32>
    %c0_22 = arith.constant 0 : index
    %c0_23 = arith.constant 0 : index
    %37 = vector.load %arg2[%c0_22, %c0_23] : memref<128x128xf32, #tpu.memory_space<vmem>>, vector<128x128xf32>
    %cst_24 = arith.constant dense<0.000000e+00> : vector<8x128xf32>
    %38 = tpu.matmul %29, %37, %cst_24 {dimension_numbers = #tpu.dot_dimension_numbers<[1], [0], [0], [1], [0, 0, 1, 1], [], []>} : vector<8x128xf32>, vector<128x128xf32>, vector<8x128xf32> -> vector<8x128xf32>
    %39 = arith.addf %36, %38 : vector<8x128xf32>
    %40 = math.tanh %39 : vector<8x128xf32>
    %41 = arith.index_cast %c3_i32 : i32 to index
    %c0_25 = arith.constant 0 : index
    %c0_26 = arith.constant 0 : index
    %42 = vector.load %arg9[%41, %c0_25, %c0_26] : memref<8x8x128xf32, #tpu.memory_space<vmem>>, vector<1x8x128xf32>
    %43 = vector.shape_cast %42 : vector<1x8x128xf32> to vector<8x128xf32>
    %44 = vector.shape_cast %40 : vector<8x128xf32> to vector<1x8x128xf32>
    tpu.vector_store %arg9[%41, %c0_25, %c0_26], %44 {strides = array<i32>} : memref<8x8x128xf32, #tpu.memory_space<vmem>>, vector<1x8x128xf32>,
    %c4_i32 = arith.constant 4 : i32
    %45 = arith.index_cast %c4_i32 : i32 to index
    %c0_27 = arith.constant 0 : index
    %c0_28 = arith.constant 0 : index
    %46 = vector.load %arg1[%45, %c0_27, %c0_28] : memref<8x8x128xf32, #tpu.memory_space<vmem>>, vector<1x8x128xf32>
    %47 = vector.shape_cast %46 : vector<1x8x128xf32> to vector<8x128xf32>
    %c0_29 = arith.constant 0 : index
    %c0_30 = arith.constant 0 : index
    %48 = vector.load %arg2[%c0_29, %c0_30] : memref<128x128xf32, #tpu.memory_space<vmem>>, vector<128x128xf32>
    %cst_31 = arith.constant dense<0.000000e+00> : vector<8x128xf32>
    %49 = tpu.matmul %40, %48, %cst_31 {dimension_numbers = #tpu.dot_dimension_numbers<[1], [0], [0], [1], [0, 0, 1, 1], [], []>} : vector<8x128xf32>, vector<128x128xf32>, vector<8x128xf32> -> vector<8x128xf32>
    %50 = arith.addf %47, %49 : vector<8x128xf32>
    %51 = math.tanh %50 : vector<8x128xf32>
    %52 = arith.index_cast %c4_i32 : i32 to index
    %c0_32 = arith.constant 0 : index
    %c0_33 = arith.constant 0 : index
    %53 = vector.load %arg9[%52, %c0_32, %c0_33] : memref<8x8x128xf32, #tpu.memory_space<vmem>>, vector<1x8x128xf32>
    %54 = vector.shape_cast %53 : vector<1x8x128xf32> to vector<8x128xf32>
    %55 = vector.shape_cast %51 : vector<8x128xf32> to vector<1x8x128xf32>
    tpu.vector_store %arg9[%52, %c0_32, %c0_33], %55 {strides = array<i32>} : memref<8x8x128xf32, #tpu.memory_space<vmem>>, vector<1x8x128xf32>,
    %c5_i32 = arith.constant 5 : i32
    %56 = arith.index_cast %c5_i32 : i32 to index
    %c0_34 = arith.constant 0 : index
    %c0_35 = arith.constant 0 : index
    %57 = vector.load %arg1[%56, %c0_34, %c0_35] : memref<8x8x128xf32, #tpu.memory_space<vmem>>, vector<1x8x128xf32>
    %58 = vector.shape_cast %57 : vector<1x8x128xf32> to vector<8x128xf32>
    %c0_36 = arith.constant 0 : index
    %c0_37 = arith.constant 0 : index
    %59 = vector.load %arg2[%c0_36, %c0_37] : memref<128x128xf32, #tpu.memory_space<vmem>>, vector<128x128xf32>
    %cst_38 = arith.constant dense<0.000000e+00> : vector<8x128xf32>
    %60 = tpu.matmul %51, %59, %cst_38 {dimension_numbers = #tpu.dot_dimension_numbers<[1], [0], [0], [1], [0, 0, 1, 1], [], []>} : vector<8x128xf32>, vector<128x128xf32>, vector<8x128xf32> -> vector<8x128xf32>
    %61 = arith.addf %58, %60 : vector<8x128xf32>
    %62 = math.tanh %61 : vector<8x128xf32>
    %63 = arith.index_cast %c5_i32 : i32 to index
    %c0_39 = arith.constant 0 : index
    %c0_40 = arith.constant 0 : index
    %64 = vector.load %arg9[%63, %c0_39, %c0_40] : memref<8x8x128xf32, #tpu.memory_space<vmem>>, vector<1x8x128xf32>
    %65 = vector.shape_cast %64 : vector<1x8x128xf32> to vector<8x128xf32>
    %66 = vector.shape_cast %62 : vector<8x128xf32> to vector<1x8x128xf32>
    tpu.vector_store %arg9[%63, %c0_39, %c0_40], %66 {strides = array<i32>} : memref<8x8x128xf32, #tpu.memory_space<vmem>>, vector<1x8x128xf32>,
    %c6_i32 = arith.constant 6 : i32
    %67 = arith.index_cast %c6_i32 : i32 to index
    %c0_41 = arith.constant 0 : index
    %c0_42 = arith.constant 0 : index
    %68 = vector.load %arg1[%67, %c0_41, %c0_42] : memref<8x8x128xf32, #tpu.memory_space<vmem>>, vector<1x8x128xf32>
    %69 = vector.shape_cast %68 : vector<1x8x128xf32> to vector<8x128xf32>
    %c0_43 = arith.constant 0 : index
    %c0_44 = arith.constant 0 : index
    %70 = vector.load %arg2[%c0_43, %c0_44] : memref<128x128xf32, #tpu.memory_space<vmem>>, vector<128x128xf32>
    %cst_45 = arith.constant dense<0.000000e+00> : vector<8x128xf32>
    %71 = tpu.matmul %62, %70, %cst_45 {dimension_numbers = #tpu.dot_dimension_numbers<[1], [0], [0], [1], [0, 0, 1, 1], [], []>} : vector<8x128xf32>, vector<128x128xf32>, vector<8x128xf32> -> vector<8x128xf32>
    %72 = arith.addf %69, %71 : vector<8x128xf32>
    %73 = math.tanh %72 : vector<8x128xf32>
    %74 = arith.index_cast %c6_i32 : i32 to index
    %c0_46 = arith.constant 0 : index
    %c0_47 = arith.constant 0 : index
    %75 = vector.load %arg9[%74, %c0_46, %c0_47] : memref<8x8x128xf32, #tpu.memory_space<vmem>>, vector<1x8x128xf32>
    %76 = vector.shape_cast %75 : vector<1x8x128xf32> to vector<8x128xf32>
    %77 = vector.shape_cast %73 : vector<8x128xf32> to vector<1x8x128xf32>
    tpu.vector_store %arg9[%74, %c0_46, %c0_47], %77 {strides = array<i32>} : memref<8x8x128xf32, #tpu.memory_space<vmem>>, vector<1x8x128xf32>,
    %c7_i32 = arith.constant 7 : i32
    %78 = arith.index_cast %c7_i32 : i32 to index
    %c0_48 = arith.constant 0 : index
    %c0_49 = arith.constant 0 : index
    %79 = vector.load %arg1[%78, %c0_48, %c0_49] : memref<8x8x128xf32, #tpu.memory_space<vmem>>, vector<1x8x128xf32>
    %80 = vector.shape_cast %79 : vector<1x8x128xf32> to vector<8x128xf32>
    %c0_50 = arith.constant 0 : index
    %c0_51 = arith.constant 0 : index
    %81 = vector.load %arg2[%c0_50, %c0_51] : memref<128x128xf32, #tpu.memory_space<vmem>>, vector<128x128xf32>
    %cst_52 = arith.constant dense<0.000000e+00> : vector<8x128xf32>
    %82 = tpu.matmul %73, %81, %cst_52 {dimension_numbers = #tpu.dot_dimension_numbers<[1], [0], [0], [1], [0, 0, 1, 1], [], []>} : vector<8x128xf32>, vector<128x128xf32>, vector<8x128xf32> -> vector<8x128xf32>
    %83 = arith.addf %80, %82 : vector<8x128xf32>
    %84 = math.tanh %83 : vector<8x128xf32>
    %85 = arith.index_cast %c7_i32 : i32 to index
    %c0_53 = arith.constant 0 : index
    %c0_54 = arith.constant 0 : index
    %86 = vector.load %arg9[%85, %c0_53, %c0_54] : memref<8x8x128xf32, #tpu.memory_space<vmem>>, vector<1x8x128xf32>
    %87 = vector.shape_cast %86 : vector<1x8x128xf32> to vector<8x128xf32>
    %88 = vector.shape_cast %84 : vector<8x128xf32> to vector<1x8x128xf32>
    tpu.vector_store %arg9[%85, %c0_53, %c0_54], %88 {strides = array<i32>} : memref<8x8x128xf32, #tpu.memory_space<vmem>>, vector<1x8x128xf32>,
    %c8_i32 = arith.constant 8 : i32
    %c0_55 = arith.constant 0 : index
    %c0_56 = arith.constant 0 : index
    %c0_57 = arith.constant 0 : index
    %89 = vector.load %arg9[%c0_55, %c0_56, %c0_57] : memref<8x8x128xf32, #tpu.memory_space<vmem>>, vector<8x8x128xf32>
    %90 = vector.shape_cast %89 : vector<8x8x128xf32> to vector<64x128xf32>
    %c0_58 = arith.constant 0 : index
    %c0_59 = arith.constant 0 : index
    %91 = vector.load %arg3[%c0_58, %c0_59] : memref<128x128xf32, #tpu.memory_space<vmem>>, vector<128x128xf32>
    %cst_60 = arith.constant dense<0.000000e+00> : vector<64x128xf32>
    %92 = tpu.matmul %90, %91, %cst_60 {dimension_numbers = #tpu.dot_dimension_numbers<[1], [0], [0], [1], [0, 0, 1, 1], [], []>} : vector<64x128xf32>, vector<128x128xf32>, vector<64x128xf32> -> vector<64x128xf32>
    %c0_61 = arith.constant 0 : index
    %c0_62 = arith.constant 0 : index
    %93 = vector.load %arg5[%c0_61, %c0_62] : memref<1x128xf32, #tpu.memory_space<vmem>>, vector<1x128xf32>
    %94 = vector.broadcast %93 : vector<1x128xf32> to vector<64x128xf32>
    %95 = arith.addf %92, %94 : vector<64x128xf32>
    %96 = vector.shape_cast %95 : vector<64x128xf32> to vector<8x8x128xf32>
    %c0_63 = arith.constant 0 : index
    %c0_64 = arith.constant 0 : index
    %c0_65 = arith.constant 0 : index
    %97 = vector.load %arg9[%c0_63, %c0_64, %c0_65] : memref<8x8x128xf32, #tpu.memory_space<vmem>>, vector<8x8x128xf32>
    tpu.vector_store %arg9[%c0_63, %c0_64, %c0_65], %96 {strides = array<i32>} : memref<8x8x128xf32, #tpu.memory_space<vmem>>, vector<8x8x128xf32>,
    %cst_66 = arith.constant 0.000000e+00 : f32
    %98 = vector.broadcast %cst_66 : f32 to vector<8x128xf32>
    %c0_i32_67 = arith.constant 0 : i32
    %99 = arith.index_cast %c0_i32_67 : i32 to index
    %c0_68 = arith.constant 0 : index
    %c0_69 = arith.constant 0 : index
    %100 = vector.load %arg9[%99, %c0_68, %c0_69] : memref<8x8x128xf32, #tpu.memory_space<vmem>>, vector<1x8x128xf32>
    %101 = vector.shape_cast %100 : vector<1x8x128xf32> to vector<8x128xf32>
    %c0_70 = arith.constant 0 : index
    %c0_71 = arith.constant 0 : index
    %102 = vector.load %arg4[%c0_70, %c0_71] : memref<128x128xf32, #tpu.memory_space<vmem>>, vector<128x128xf32>
    %cst_72 = arith.constant dense<0.000000e+00> : vector<8x128xf32>
    %103 = tpu.matmul %98, %102, %cst_72 {dimension_numbers = #tpu.dot_dimension_numbers<[1], [0], [0], [1], [0, 0, 1, 1], [], []>} : vector<8x128xf32>, vector<128x128xf32>, vector<8x128xf32> -> vector<8x128xf32>
    %104 = arith.addf %101, %103 : vector<8x128xf32>
    %105 = math.tanh %104 : vector<8x128xf32>
    %c4_i32_73 = arith.constant 4 : i32
    %106 = arith.cmpi sge, %c0_i32_67, %c4_i32_73 : i32
    %107 = arith.extui %106 : i1 to i32
    %c0_i32_74 = arith.constant 0 : i32
    %108 = arith.cmpi ne, %107, %c0_i32_74 : i32
    scf.if %108 {
      %188 = arith.index_cast %c0_i32_67 : i32 to index
      %c0_142 = arith.constant 0 : index
      %c0_143 = arith.constant 0 : index
      %189 = vector.load %arg9[%188, %c0_142, %c0_143] : memref<8x8x128xf32, #tpu.memory_space<vmem>>, vector<1x8x128xf32>
      %190 = vector.shape_cast %189 : vector<1x8x128xf32> to vector<8x128xf32>
      %191 = vector.shape_cast %105 : vector<8x128xf32> to vector<1x8x128xf32>
      tpu.vector_store %arg9[%188, %c0_142, %c0_143], %191 {strides = array<i32>} : memref<8x8x128xf32, #tpu.memory_space<vmem>>, vector<1x8x128xf32>,
    } else {
    }
    %c1_i32_75 = arith.constant 1 : i32
    %109 = arith.index_cast %c1_i32_75 : i32 to index
    %c0_76 = arith.constant 0 : index
    %c0_77 = arith.constant 0 : index
    %110 = vector.load %arg9[%109, %c0_76, %c0_77] : memref<8x8x128xf32, #tpu.memory_space<vmem>>, vector<1x8x128xf32>
    %111 = vector.shape_cast %110 : vector<1x8x128xf32> to vector<8x128xf32>
    %c0_78 = arith.constant 0 : index
    %c0_79 = arith.constant 0 : index
    %112 = vector.load %arg4[%c0_78, %c0_79] : memref<128x128xf32, #tpu.memory_space<vmem>>, vector<128x128xf32>
    %cst_80 = arith.constant dense<0.000000e+00> : vector<8x128xf32>
    %113 = tpu.matmul %105, %112, %cst_80 {dimension_numbers = #tpu.dot_dimension_numbers<[1], [0], [0], [1], [0, 0, 1, 1], [], []>} : vector<8x128xf32>, vector<128x128xf32>, vector<8x128xf32> -> vector<8x128xf32>
    %114 = arith.addf %111, %113 : vector<8x128xf32>
    %115 = math.tanh %114 : vector<8x128xf32>
    %c4_i32_81 = arith.constant 4 : i32
    %116 = arith.cmpi sge, %c1_i32_75, %c4_i32_81 : i32
    %117 = arith.extui %116 : i1 to i32
    %c0_i32_82 = arith.constant 0 : i32
    %118 = arith.cmpi ne, %117, %c0_i32_82 : i32
    scf.if %118 {
      %188 = arith.index_cast %c1_i32_75 : i32 to index
      %c0_142 = arith.constant 0 : index
      %c0_143 = arith.constant 0 : index
      %189 = vector.load %arg9[%188, %c0_142, %c0_143] : memref<8x8x128xf32, #tpu.memory_space<vmem>>, vector<1x8x128xf32>
      %190 = vector.shape_cast %189 : vector<1x8x128xf32> to vector<8x128xf32>
      %191 = vector.shape_cast %115 : vector<8x128xf32> to vector<1x8x128xf32>
      tpu.vector_store %arg9[%188, %c0_142, %c0_143], %191 {strides = array<i32>} : memref<8x8x128xf32, #tpu.memory_space<vmem>>, vector<1x8x128xf32>,
    } else {
    }
    %c2_i32_83 = arith.constant 2 : i32
    %119 = arith.index_cast %c2_i32_83 : i32 to index
    %c0_84 = arith.constant 0 : index
    %c0_85 = arith.constant 0 : index
    %120 = vector.load %arg9[%119, %c0_84, %c0_85] : memref<8x8x128xf32, #tpu.memory_space<vmem>>, vector<1x8x128xf32>
    %121 = vector.shape_cast %120 : vector<1x8x128xf32> to vector<8x128xf32>
    %c0_86 = arith.constant 0 : index
    %c0_87 = arith.constant 0 : index
    %122 = vector.load %arg4[%c0_86, %c0_87] : memref<128x128xf32, #tpu.memory_space<vmem>>, vector<128x128xf32>
    %cst_88 = arith.constant dense<0.000000e+00> : vector<8x128xf32>
    %123 = tpu.matmul %115, %122, %cst_88 {dimension_numbers = #tpu.dot_dimension_numbers<[1], [0], [0], [1], [0, 0, 1, 1], [], []>} : vector<8x128xf32>, vector<128x128xf32>, vector<8x128xf32> -> vector<8x128xf32>
    %124 = arith.addf %121, %123 : vector<8x128xf32>
    %125 = math.tanh %124 : vector<8x128xf32>
    %c4_i32_89 = arith.constant 4 : i32
    %126 = arith.cmpi sge, %c2_i32_83, %c4_i32_89 : i32
    %127 = arith.extui %126 : i1 to i32
    %c0_i32_90 = arith.constant 0 : i32
    %128 = arith.cmpi ne, %127, %c0_i32_90 : i32
    scf.if %128 {
      %188 = arith.index_cast %c2_i32_83 : i32 to index
      %c0_142 = arith.constant 0 : index
      %c0_143 = arith.constant 0 : index
      %189 = vector.load %arg9[%188, %c0_142, %c0_143] : memref<8x8x128xf32, #tpu.memory_space<vmem>>, vector<1x8x128xf32>
      %190 = vector.shape_cast %189 : vector<1x8x128xf32> to vector<8x128xf32>
      %191 = vector.shape_cast %125 : vector<8x128xf32> to vector<1x8x128xf32>
      tpu.vector_store %arg9[%188, %c0_142, %c0_143], %191 {strides = array<i32>} : memref<8x8x128xf32, #tpu.memory_space<vmem>>, vector<1x8x128xf32>,
    } else {
    }
    %c3_i32_91 = arith.constant 3 : i32
    %129 = arith.index_cast %c3_i32_91 : i32 to index
    %c0_92 = arith.constant 0 : index
    %c0_93 = arith.constant 0 : index
    %130 = vector.load %arg9[%129, %c0_92, %c0_93] : memref<8x8x128xf32, #tpu.memory_space<vmem>>, vector<1x8x128xf32>
    %131 = vector.shape_cast %130 : vector<1x8x128xf32> to vector<8x128xf32>
    %c0_94 = arith.constant 0 : index
    %c0_95 = arith.constant 0 : index
    %132 = vector.load %arg4[%c0_94, %c0_95] : memref<128x128xf32, #tpu.memory_space<vmem>>, vector<128x128xf32>
    %cst_96 = arith.constant dense<0.000000e+00> : vector<8x128xf32>
    %133 = tpu.matmul %125, %132, %cst_96 {dimension_numbers = #tpu.dot_dimension_numbers<[1], [0], [0], [1], [0, 0, 1, 1], [], []>} : vector<8x128xf32>, vector<128x128xf32>, vector<8x128xf32> -> vector<8x128xf32>
    %134 = arith.addf %131, %133 : vector<8x128xf32>
    %135 = math.tanh %134 : vector<8x128xf32>
    %c4_i32_97 = arith.constant 4 : i32
    %136 = arith.cmpi sge, %c3_i32_91, %c4_i32_97 : i32
    %137 = arith.extui %136 : i1 to i32
    %c0_i32_98 = arith.constant 0 : i32
    %138 = arith.cmpi ne, %137, %c0_i32_98 : i32
    scf.if %138 {
      %188 = arith.index_cast %c3_i32_91 : i32 to index
      %c0_142 = arith.constant 0 : index
      %c0_143 = arith.constant 0 : index
      %189 = vector.load %arg9[%188, %c0_142, %c0_143] : memref<8x8x128xf32, #tpu.memory_space<vmem>>, vector<1x8x128xf32>
      %190 = vector.shape_cast %189 : vector<1x8x128xf32> to vector<8x128xf32>
      %191 = vector.shape_cast %135 : vector<8x128xf32> to vector<1x8x128xf32>
      tpu.vector_store %arg9[%188, %c0_142, %c0_143], %191 {strides = array<i32>} : memref<8x8x128xf32, #tpu.memory_space<vmem>>, vector<1x8x128xf32>,
    } else {
    }
    %c4_i32_99 = arith.constant 4 : i32
    %139 = arith.index_cast %c4_i32_99 : i32 to index
    %c0_100 = arith.constant 0 : index
    %c0_101 = arith.constant 0 : index
    %140 = vector.load %arg9[%139, %c0_100, %c0_101] : memref<8x8x128xf32, #tpu.memory_space<vmem>>, vector<1x8x128xf32>
    %141 = vector.shape_cast %140 : vector<1x8x128xf32> to vector<8x128xf32>
    %c0_102 = arith.constant 0 : index
    %c0_103 = arith.constant 0 : index
    %142 = vector.load %arg4[%c0_102, %c0_103] : memref<128x128xf32, #tpu.memory_space<vmem>>, vector<128x128xf32>
    %cst_104 = arith.constant dense<0.000000e+00> : vector<8x128xf32>
    %143 = tpu.matmul %135, %142, %cst_104 {dimension_numbers = #tpu.dot_dimension_numbers<[1], [0], [0], [1], [0, 0, 1, 1], [], []>} : vector<8x128xf32>, vector<128x128xf32>, vector<8x128xf32> -> vector<8x128xf32>
    %144 = arith.addf %141, %143 : vector<8x128xf32>
    %145 = math.tanh %144 : vector<8x128xf32>
    %c4_i32_105 = arith.constant 4 : i32
    %146 = arith.cmpi sge, %c4_i32_99, %c4_i32_105 : i32
    %147 = arith.extui %146 : i1 to i32
    %c0_i32_106 = arith.constant 0 : i32
    %148 = arith.cmpi ne, %147, %c0_i32_106 : i32
    scf.if %148 {
      %188 = arith.index_cast %c4_i32_99 : i32 to index
      %c0_142 = arith.constant 0 : index
      %c0_143 = arith.constant 0 : index
      %189 = vector.load %arg9[%188, %c0_142, %c0_143] : memref<8x8x128xf32, #tpu.memory_space<vmem>>, vector<1x8x128xf32>
      %190 = vector.shape_cast %189 : vector<1x8x128xf32> to vector<8x128xf32>
      %191 = vector.shape_cast %145 : vector<8x128xf32> to vector<1x8x128xf32>
      tpu.vector_store %arg9[%188, %c0_142, %c0_143], %191 {strides = array<i32>} : memref<8x8x128xf32, #tpu.memory_space<vmem>>, vector<1x8x128xf32>,
    } else {
    }
    %c5_i32_107 = arith.constant 5 : i32
    %149 = arith.index_cast %c5_i32_107 : i32 to index
    %c0_108 = arith.constant 0 : index
    %c0_109 = arith.constant 0 : index
    %150 = vector.load %arg9[%149, %c0_108, %c0_109] : memref<8x8x128xf32, #tpu.memory_space<vmem>>, vector<1x8x128xf32>
    %151 = vector.shape_cast %150 : vector<1x8x128xf32> to vector<8x128xf32>
    %c0_110 = arith.constant 0 : index
    %c0_111 = arith.constant 0 : index
    %152 = vector.load %arg4[%c0_110, %c0_111] : memref<128x128xf32, #tpu.memory_space<vmem>>, vector<128x128xf32>
    %cst_112 = arith.constant dense<0.000000e+00> : vector<8x128xf32>
    %153 = tpu.matmul %145, %152, %cst_112 {dimension_numbers = #tpu.dot_dimension_numbers<[1], [0], [0], [1], [0, 0, 1, 1], [], []>} : vector<8x128xf32>, vector<128x128xf32>, vector<8x128xf32> -> vector<8x128xf32>
    %154 = arith.addf %151, %153 : vector<8x128xf32>
    %155 = math.tanh %154 : vector<8x128xf32>
    %c4_i32_113 = arith.constant 4 : i32
    %156 = arith.cmpi sge, %c5_i32_107, %c4_i32_113 : i32
    %157 = arith.extui %156 : i1 to i32
    %c0_i32_114 = arith.constant 0 : i32
    %158 = arith.cmpi ne, %157, %c0_i32_114 : i32
    scf.if %158 {
      %188 = arith.index_cast %c5_i32_107 : i32 to index
      %c0_142 = arith.constant 0 : index
      %c0_143 = arith.constant 0 : index
      %189 = vector.load %arg9[%188, %c0_142, %c0_143] : memref<8x8x128xf32, #tpu.memory_space<vmem>>, vector<1x8x128xf32>
      %190 = vector.shape_cast %189 : vector<1x8x128xf32> to vector<8x128xf32>
      %191 = vector.shape_cast %155 : vector<8x128xf32> to vector<1x8x128xf32>
      tpu.vector_store %arg9[%188, %c0_142, %c0_143], %191 {strides = array<i32>} : memref<8x8x128xf32, #tpu.memory_space<vmem>>, vector<1x8x128xf32>,
    } else {
    }
    %c6_i32_115 = arith.constant 6 : i32
    %159 = arith.index_cast %c6_i32_115 : i32 to index
    %c0_116 = arith.constant 0 : index
    %c0_117 = arith.constant 0 : index
    %160 = vector.load %arg9[%159, %c0_116, %c0_117] : memref<8x8x128xf32, #tpu.memory_space<vmem>>, vector<1x8x128xf32>
    %161 = vector.shape_cast %160 : vector<1x8x128xf32> to vector<8x128xf32>
    %c0_118 = arith.constant 0 : index
    %c0_119 = arith.constant 0 : index
    %162 = vector.load %arg4[%c0_118, %c0_119] : memref<128x128xf32, #tpu.memory_space<vmem>>, vector<128x128xf32>
    %cst_120 = arith.constant dense<0.000000e+00> : vector<8x128xf32>
    %163 = tpu.matmul %155, %162, %cst_120 {dimension_numbers = #tpu.dot_dimension_numbers<[1], [0], [0], [1], [0, 0, 1, 1], [], []>} : vector<8x128xf32>, vector<128x128xf32>, vector<8x128xf32> -> vector<8x128xf32>
    %164 = arith.addf %161, %163 : vector<8x128xf32>
    %165 = math.tanh %164 : vector<8x128xf32>
    %c4_i32_121 = arith.constant 4 : i32
    %166 = arith.cmpi sge, %c6_i32_115, %c4_i32_121 : i32
    %167 = arith.extui %166 : i1 to i32
    %c0_i32_122 = arith.constant 0 : i32
    %168 = arith.cmpi ne, %167, %c0_i32_122 : i32
    scf.if %168 {
      %188 = arith.index_cast %c6_i32_115 : i32 to index
      %c0_142 = arith.constant 0 : index
      %c0_143 = arith.constant 0 : index
      %189 = vector.load %arg9[%188, %c0_142, %c0_143] : memref<8x8x128xf32, #tpu.memory_space<vmem>>, vector<1x8x128xf32>
      %190 = vector.shape_cast %189 : vector<1x8x128xf32> to vector<8x128xf32>
      %191 = vector.shape_cast %165 : vector<8x128xf32> to vector<1x8x128xf32>
      tpu.vector_store %arg9[%188, %c0_142, %c0_143], %191 {strides = array<i32>} : memref<8x8x128xf32, #tpu.memory_space<vmem>>, vector<1x8x128xf32>,
    } else {
    }
    %c7_i32_123 = arith.constant 7 : i32
    %169 = arith.index_cast %c7_i32_123 : i32 to index
    %c0_124 = arith.constant 0 : index
    %c0_125 = arith.constant 0 : index
    %170 = vector.load %arg9[%169, %c0_124, %c0_125] : memref<8x8x128xf32, #tpu.memory_space<vmem>>, vector<1x8x128xf32>
    %171 = vector.shape_cast %170 : vector<1x8x128xf32> to vector<8x128xf32>
    %c0_126 = arith.constant 0 : index
    %c0_127 = arith.constant 0 : index
    %172 = vector.load %arg4[%c0_126, %c0_127] : memref<128x128xf32, #tpu.memory_space<vmem>>, vector<128x128xf32>
    %cst_128 = arith.constant dense<0.000000e+00> : vector<8x128xf32>
    %173 = tpu.matmul %165, %172, %cst_128 {dimension_numbers = #tpu.dot_dimension_numbers<[1], [0], [0], [1], [0, 0, 1, 1], [], []>} : vector<8x128xf32>, vector<128x128xf32>, vector<8x128xf32> -> vector<8x128xf32>
    %174 = arith.addf %171, %173 : vector<8x128xf32>
    %175 = math.tanh %174 : vector<8x128xf32>
    %c4_i32_129 = arith.constant 4 : i32
    %176 = arith.cmpi sge, %c7_i32_123, %c4_i32_129 : i32
    %177 = arith.extui %176 : i1 to i32
    %c0_i32_130 = arith.constant 0 : i32
    %178 = arith.cmpi ne, %177, %c0_i32_130 : i32
    scf.if %178 {
      %188 = arith.index_cast %c7_i32_123 : i32 to index
      %c0_142 = arith.constant 0 : index
      %c0_143 = arith.constant 0 : index
      %189 = vector.load %arg9[%188, %c0_142, %c0_143] : memref<8x8x128xf32, #tpu.memory_space<vmem>>, vector<1x8x128xf32>
      %190 = vector.shape_cast %189 : vector<1x8x128xf32> to vector<8x128xf32>
      %191 = vector.shape_cast %175 : vector<8x128xf32> to vector<1x8x128xf32>
      tpu.vector_store %arg9[%188, %c0_142, %c0_143], %191 {strides = array<i32>} : memref<8x8x128xf32, #tpu.memory_space<vmem>>, vector<1x8x128xf32>,
    } else {
    }
    %c8_i32_131 = arith.constant 8 : i32
    %c4 = arith.constant 4 : index
    %c0_132 = arith.constant 0 : index
    %c0_133 = arith.constant 0 : index
    %179 = vector.load %arg9[%c4, %c0_132, %c0_133] : memref<8x8x128xf32, #tpu.memory_space<vmem>>, vector<4x8x128xf32>
    %180 = vector.shape_cast %179 : vector<4x8x128xf32> to vector<32x128xf32>
    %c0_134 = arith.constant 0 : index
    %c0_135 = arith.constant 0 : index
    %181 = vector.load %arg6[%c0_134, %c0_135] : memref<128x128xf32, #tpu.memory_space<vmem>>, vector<128x128xf32>
    %cst_136 = arith.constant dense<0.000000e+00> : vector<32x128xf32>
    %182 = tpu.matmul %180, %181, %cst_136 {dimension_numbers = #tpu.dot_dimension_numbers<[1], [0], [0], [1], [0, 0, 1, 1], [], []>} : vector<32x128xf32>, vector<128x128xf32>, vector<32x128xf32> -> vector<32x128xf32>
    %c0_137 = arith.constant 0 : index
    %c0_138 = arith.constant 0 : index
    %183 = vector.load %arg7[%c0_137, %c0_138] : memref<1x128xf32, #tpu.memory_space<vmem>>, vector<1x128xf32>
    %184 = vector.broadcast %183 : vector<1x128xf32> to vector<32x128xf32>
    %185 = arith.addf %182, %184 : vector<32x128xf32>
    %186 = vector.shape_cast %185 : vector<32x128xf32> to vector<4x8x128xf32>
    %c0_139 = arith.constant 0 : index
    %c0_140 = arith.constant 0 : index
    %c0_141 = arith.constant 0 : index
    %187 = vector.load %arg8[%c0_139, %c0_140, %c0_141] : memref<4x8x128xf32, #tpu.memory_space<vmem>>, vector<4x8x128xf32>
    tpu.vector_store %arg8[%c0_139, %c0_140, %c0_141], %186 {strides = array<i32>} : memref<4x8x128xf32, #tpu.memory_space<vmem>>, vector<4x8x128xf32>,
    return
  }
  func.func @transform_0(%arg0: i32) -> (i32, i32, i32) {
    %c0_i32 = arith.constant 0 : i32
    %c0_i32_0 = arith.constant 0 : i32
    %c0_i32_1 = arith.constant 0 : i32
    return %c0_i32, %arg0, %c0_i32_0 : i32, i32, i32
  }
  func.func @transform_1(%arg0: i32) -> (i32, i32) {
    %c0_i32 = arith.constant 0 : i32
    %c0_i32_0 = arith.constant 0 : i32
    %c0_i32_1 = arith.constant 0 : i32
    return %c0_i32, %c0_i32_0 : i32, i32
  }
  func.func @transform_2(%arg0: i32) -> (i32, i32) {
    %c0_i32 = arith.constant 0 : i32
    %c0_i32_0 = arith.constant 0 : i32
    %c0_i32_1 = arith.constant 0 : i32
    return %c0_i32, %c0_i32_0 : i32, i32
  }
  func.func @transform_3(%arg0: i32) -> (i32, i32) {
    %c0_i32 = arith.constant 0 : i32
    %c0_i32_0 = arith.constant 0 : i32
    %c0_i32_1 = arith.constant 0 : i32
    return %c0_i32, %c0_i32_0 : i32, i32
  }
  func.func @transform_4(%arg0: i32) -> (i32, i32) {
    %c0_i32 = arith.constant 0 : i32
    %c0_i32_0 = arith.constant 0 : i32
    %c0_i32_1 = arith.constant 0 : i32
    return %c0_i32, %c0_i32_0 : i32, i32
  }
  func.func @transform_5(%arg0: i32) -> (i32, i32) {
    %c0_i32 = arith.constant 0 : i32
    %c0_i32_0 = arith.constant 0 : i32
    %c0_i32_1 = arith.constant 0 : i32
    return %c0_i32, %c0_i32_0 : i32, i32
  }
  func.func @transform_6(%arg0: i32) -> (i32, i32) {
    %c0_i32 = arith.constant 0 : i32
    %c0_i32_0 = arith.constant 0 : i32
    %c0_i32_1 = arith.constant 0 : i32
    return %c0_i32, %c0_i32_0 : i32, i32
  }
  func.func @transform_7(%arg0: i32) -> (i32, i32, i32) {
    %c0_i32 = arith.constant 0 : i32
    %c0_i32_0 = arith.constant 0 : i32
    %c0_i32_1 = arith.constant 0 : i32
    return %c0_i32, %arg0, %c0_i32_0 : i32, i32, i32
  }
}

</mosaic_0001>

<bundles_post_ra>
// kernel: rnn_model_forward.1
= control target key start
LH: loop header
LB: loop body
LE: loop exit
PB: predicated region body
PF: predicated region fallthrough
CT: control target
= control target key end

     0   :  { %v3126_v0 = vmov 0.0|0.0   ;;  %vm3127_vm0 = vmmov 0   ;;  %v3128_v4 = vmov 0.0   ;;  %s3776_s1 = inlined_call_operand.vmem [shape: f32[128,128], index: 1, kind: input, shape index: {}]   ;;  %s3777_s0 = inlined_call_operand.vmem [shape: f32[8,8,128], index: 0, kind: input, shape index: {}]   ;;  %s3778_s2 = inlined_call_operand.vmem [shape: f32[128,128], index: 2, kind: input, shape index: {}]   ;;  %s3779_s3 = inlined_call_operand.vmem [shape: f32[128,128], index: 3, kind: input, shape index: {}]   ;;  %s3780_s4 = inlined_call_operand.vmem [shape: f32[1,128], index: 4, kind: input, shape index: {}]   ;;  %s3781_s5 = inlined_call_operand.vmem [shape: f32[128,128], index: 5, kind: input, shape index: {}]   ;;  %s3782_s6 = inlined_call_operand.vmem [shape: f32[1,128], index: 6, kind: input, shape index: {}]   ;;  %s3783_s7 = inlined_call_operand.vmem [shape: f32[4,8,128], index: 7, kind: output, shape index: {}]  }
   0x1   :  { %2643 = vmatprep.subr.bf16.mxu0 %v3126_v0  ;;  %v27_v1 = vld [vmem:[%s3776_s1] sm:$0xff]  ;;  %v28_v2 = vld [vmem:[%s3776_s1 + $0x8] sm:$0xff]  ;;  %v29_v3 = vld [vmem:[%s3776_s1 + $0x10] sm:$0xff]  ;;  %2033 = vmatprep.mubr.msk.f32.mxu0 %vm3127_vm0, %v3128_v4 }
   0x2   :  { %v3181_v5 = vpack.c.bf16 %v28_v2, %v27_v1  ;;  %v30_v6 = vld [vmem:[%s3776_s1 + $0x18] sm:$0xff]  ;;  %2667 = vmatprep.subr.bf16.mxu1 %v3126_v0  ;;  %2068 = vmatprep.mubr.msk.f32.mxu1 %vm3127_vm0, %v3128_v4  ;;  %v31_v8 = vld [vmem:[%s3776_s1 + $0x20] sm:$0xff]  ;;  %v32_v9 = vld [vmem:[%s3776_s1 + $0x28] sm:$0xff] }
   0x3   :  { %v3190_v7 = vpack.c.bf16 %v30_v6, %v29_v3  ;;  %v3202_v10 = vpack.c.bf16 %v32_v9, %v31_v8  ;;  %v33_v11 = vld [vmem:[%s3776_s1 + $0x30] sm:$0xff]  ;;  %v34_v12 = vld [vmem:[%s3776_s1 + $0x38] sm:$0xff]  ;;  %v35_v14 = vld [vmem:[%s3776_s1 + $0x40] sm:$0xff] }
   0x4   :  { %2645 = vmatpush3.bf16.msra.mxu0 %v3181_v5  ;;  %2669 = vmatpush3.bf16.msra.mxu1 %v3181_v5  ;;  %v3214_v13 = vpack.c.bf16 %v34_v12, %v33_v11  ;;  %v36_v15 = vld [vmem:[%s3776_s1 + $0x48] sm:$0xff]  ;;  %v37_v17 = vld [vmem:[%s3776_s1 + $0x50] sm:$0xff]  ;;  %v38_v18 = vld [vmem:[%s3776_s1 + $0x58] sm:$0xff] }
   0x5   :  { %2646 = vmatprep.subr.bf16.mxu0 %v3126_v0  ;;  %2670 = vmatprep.subr.bf16.mxu1 %v3126_v0  ;;  %v3226_v16 = vpack.c.bf16 %v36_v15, %v35_v14  ;;  %v3238_v19 = vpack.c.bf16 %v38_v18, %v37_v17  ;;  %v39_v20 = vld [vmem:[%s3776_s1 + $0x60] sm:$0xff]  ;;  %v40_v21 = vld [vmem:[%s3776_s1 + $0x68] sm:$0xff]  ;;  %v41_v23 = vld [vmem:[%s3776_s1 + $0x70] sm:$0xff] }
   0x6   :  { %v3250_v22 = vpack.c.bf16 %v40_v21, %v39_v20  ;;  %v42_v24 = vld [vmem:[%s3776_s1 + $0x78] sm:$0xff]  ;;  %v26_v26 = vld [vmem:[%s3777_s0] sm:$0xff]  ;;  %v1676_v31 = vld [vmem:[%s3777_s0 + $0x8] sm:$0xff] }
   0x7   :  { %v3262_v25 = vpack.c.bf16 %v42_v24, %v41_v23  ;;  %v1677_v36 = vld [vmem:[%s3777_s0 + $0x10] sm:$0xff]  ;;  %v1678_v41 = vld [vmem:[%s3777_s0 + $0x18] sm:$0xff]  ;;  %v1679_v46 = vld [vmem:[%s3777_s0 + $0x20] sm:$0xff] }
   0x8   :  { %2648 = vmatpush3.bf16.msra.mxu0 %v3190_v7  ;;  %2672 = vmatpush3.bf16.msra.mxu1 %v3190_v7  ;;  %v768_v51 = vld [vmem:[%s3778_s2] sm:$0xff]  ;;  %v769_v52 = vld [vmem:[%s3778_s2 + $0x8] sm:$0xff]  ;;  %v770_v58 = vld [vmem:[%s3778_s2 + $0x10] sm:$0xff] }
   0x9   :  { %2649 = vmatprep.subr.bf16.mxu0 %v3126_v0  ;;  %2673 = vmatprep.subr.bf16.mxu1 %v3126_v0  ;;  %v2835_v53 = vpack.c.bf16 %v769_v52, %v768_v51  ;;  %v1680_v54 = vld [vmem:[%s3777_s0 + $0x28] sm:$0xff]  ;;  %v771_v59 = vld [vmem:[%s3778_s2 + $0x18] sm:$0xff]  ;;  %v772_v62 = vld [vmem:[%s3778_s2 + $0x20] sm:$0xff] }
   0xa   :  { %v2839_v60 = vpack.c.bf16 %v771_v59, %v770_v58  ;;  %v773_v63 = vld [vmem:[%s3778_s2 + $0x28] sm:$0xff]  ;;  %v774_v2 = vld [vmem:[%s3778_s2 + $0x30] sm:$0xff]  ;;  %v775_v3 = vld [vmem:[%s3778_s2 + $0x38] sm:$0xff] }
   0xb   :  { %v2843_v1 = vpack.c.bf16 %v773_v63, %v772_v62  ;;  %v776_v6 = vld [vmem:[%s3778_s2 + $0x40] sm:$0xff]  ;;  %v778_v9 = vld [vmem:[%s3778_s2 + $0x50] sm:$0xff] }
   0xc   :  { %2651 = vmatpush3.bf16.msra.mxu0 %v3202_v10  ;;  %2675 = vmatpush3.bf16.msra.mxu1 %v3202_v10  ;;  %v780_v12 = vld [vmem:[%s3778_s2 + $0x60] sm:$0xff]  ;;  %v782_v15 = vld [vmem:[%s3778_s2 + $0x70] sm:$0xff] }
   0xd   :  { %2652 = vmatprep.subr.bf16.mxu0 %v3126_v0  ;;  %2676 = vmatprep.subr.bf16.mxu1 %v3126_v0  ;;  %v905_v18 = vld [vmem:[%s3779_s3] sm:$0xff]  ;;  %v907_v21 = vld [vmem:[%s3779_s3 + $0x10] sm:$0xff] }
   0xe   :  { %v909_v24 = vld [vmem:[%s3779_s3 + $0x20] sm:$0xff] }
   0xf   :  { %v3604_v58 = vld [vmem:[%s3780_s4] ss:$0 sm:$0xff] }
  0x10   :  { %2654 = vmatpush3.bf16.msra.mxu0 %v3214_v13  ;;  %2678 = vmatpush3.bf16.msra.mxu1 %v3214_v13 }
  0x11   :  { %2655 = vmatprep.subr.bf16.mxu0 %v3126_v0  ;;  %2679 = vmatprep.subr.bf16.mxu1 %v3126_v0 }
  0x14   :  { %2657 = vmatpush3.bf16.msra.mxu0 %v3226_v16  ;;  %2681 = vmatpush3.bf16.msra.mxu1 %v3226_v16 }
  0x15   :  { %2658 = vmatprep.subr.bf16.mxu0 %v3126_v0  ;;  %2682 = vmatprep.subr.bf16.mxu1 %v3126_v0 }
  0x18   :  { %2660 = vmatpush3.bf16.msra.mxu0 %v3238_v19  ;;  %2684 = vmatpush3.bf16.msra.mxu1 %v3238_v19 }
  0x19   :  { %2661 = vmatprep.subr.bf16.mxu0 %v3126_v0  ;;  %2685 = vmatprep.subr.bf16.mxu1 %v3126_v0 }
  0x1c   :  { %2663 = vmatpush3.bf16.msra.mxu0 %v3250_v22  ;;  %2687 = vmatpush3.bf16.msra.mxu1 %v3250_v22 }
  0x1d   :  { %2664 = vmatprep.subr.bf16.mxu0 %v3126_v0  ;;  %2688 = vmatprep.subr.bf16.mxu1 %v3126_v0 }
  0x20   :  { %2666 = vmatpush3.bf16.msra.mxu0 %v3262_v25  ;;  %2690 = vmatpush3.bf16.msra.mxu1 %v3262_v25 }
  0x21   :  { %2691 = vmatprep.subr.bf16.mxu0 %v3126_v0  ;;  %2715 = vmatprep.subr.bf16.mxu1 %v3126_v0 }
  0x23   :  { %2034 = vmatmul.mubr.f32.vlgmr.msra.gmra.mrb[0].mxu0 %v3128_v4 }
  0x24   :  { %2693 = vmatpush3.bf16.msra.mxu0 %v3181_v5  ;;  %2103 = vmatprep.mubr.msk.f32.mxu0 %vm3127_vm0, %v3128_v4 }
  0x25   :  { %2694 = vmatprep.subr.bf16.mxu0 %v3126_v0 }
  0x28   :  { %2696 = vmatpush3.bf16.msra.mxu0 %v3190_v7 }
  0x29   :  { %2697 = vmatprep.subr.bf16.mxu0 %v3126_v0 }
  0x2c   :  { %2699 = vmatpush3.bf16.msra.mxu0 %v3202_v10 }
  0x2d   :  { %2700 = vmatprep.subr.bf16.mxu0 %v3126_v0 }
  0x30   :  { %2702 = vmatpush3.bf16.msra.mxu0 %v3214_v13 }
  0x31   :  { %2703 = vmatprep.subr.bf16.mxu0 %v3126_v0 }
  0x34   :  { %2705 = vmatpush3.bf16.msra.mxu0 %v3226_v16 }
  0x35   :  { %2706 = vmatprep.subr.bf16.mxu0 %v3126_v0 }
  0x38   :  { %2708 = vmatpush3.bf16.msra.mxu0 %v3238_v19 }
  0x39   :  { %2709 = vmatprep.subr.bf16.mxu0 %v3126_v0 }
  0x3c   :  { %2711 = vmatpush3.bf16.msra.mxu0 %v3250_v22 }
  0x3d   :  { %2712 = vmatprep.subr.bf16.mxu0 %v3126_v0 }
  0x40   :  { %2714 = vmatpush3.bf16.msra.mxu0 %v3262_v25 }
  0x41   :  { %2739 = vmatprep.subr.bf16.mxu0 %v3126_v0 }
  0xf6   :  { %v109_v27 = vpop.f32.mrb[0].mxu0 }
  0xf7   :  { %v113_v28 = vadd.f32 %v109_v27, %v26_v26  ;;  %v2035_v29 = vpop.f32.mrb[1].mxu0  ;;  %v911_v27 = vld [vmem:[%s3779_s3 + $0x30] sm:$0xff] }
  0xf9   :  { %3094 = vtanh.f32 %v113_v28  ;;  %v912_v28 = vld [vmem:[%s3779_s3 + $0x38] sm:$0xff] }
  0xfa   :  { %v3502_v29 = vpack.c.bf16 %v912_v28, %v911_v27 }
 0x103   :  { %v3293_v30 = vpop.eup %3094 }
 0x104   :  { %2069 = vmatmul.mubr.f32.vlgmr.msra.gmra.mrb[0].mxu1 %v3293_v30 }
 0x105   :  { %2717 = vmatpush3.bf16.msra.mxu1 %v3181_v5  ;;  %2138 = vmatprep.mubr.msk.f32.mxu1 %vm3127_vm0, %v3128_v4 }
 0x106   :  { %2718 = vmatprep.subr.bf16.mxu1 %v3126_v0 }
 0x109   :  { %2720 = vmatpush3.bf16.msra.mxu1 %v3190_v7 }
 0x10a   :  { %2721 = vmatprep.subr.bf16.mxu1 %v3126_v0 }
 0x10d   :  { %2723 = vmatpush3.bf16.msra.mxu1 %v3202_v10 }
 0x10e   :  { %2724 = vmatprep.subr.bf16.mxu1 %v3126_v0 }
 0x111   :  { %2726 = vmatpush3.bf16.msra.mxu1 %v3214_v13 }
 0x112   :  { %2727 = vmatprep.subr.bf16.mxu1 %v3126_v0 }
 0x115   :  { %2729 = vmatpush3.bf16.msra.mxu1 %v3226_v16 }
 0x116   :  { %2730 = vmatprep.subr.bf16.mxu1 %v3126_v0 }
 0x119   :  { %2732 = vmatpush3.bf16.msra.mxu1 %v3238_v19 }
 0x11a   :  { %2733 = vmatprep.subr.bf16.mxu1 %v3126_v0 }
 0x11d   :  { %2735 = vmatpush3.bf16.msra.mxu1 %v3250_v22 }
 0x11e   :  { %2736 = vmatprep.subr.bf16.mxu1 %v3126_v0 }
 0x121   :  { %2738 = vmatpush3.bf16.msra.mxu1 %v3262_v25 }
 0x122   :  { %2763 = vmatprep.subr.bf16.mxu1 %v3126_v0 }
 0x1d7   :  { %v200_v32 = vpop.f32.mrb[0].mxu1 }
 0x1d8   :  { %v204_v33 = vadd.f32 %v1676_v31, %v200_v32  ;;  %v2070_v34 = vpop.f32.mrb[1].mxu1  ;;  %v914_v31 = vld [vmem:[%s3779_s3 + $0x48] sm:$0xff] }
 0x1d9   :  { %v916_v34 = vld [vmem:[%s3779_s3 + $0x58] sm:$0xff] }
 0x1da   :  { %3096 = vtanh.f32 %v204_v33  ;;  %v915_v33 = vld [vmem:[%s3779_s3 + $0x50] sm:$0xff] }
 0x1e4   :  { %v3317_v35 = vpop.eup %3096 }
 0x1e5   :  { %2104 = vmatmul.mubr.f32.vlgmr.msra.gmra.mrb[2].mxu0 %v3317_v35 }
 0x1e6   :  { %2741 = vmatpush3.bf16.msra.mxu0 %v3181_v5  ;;  %2173 = vmatprep.mubr.msk.f32.mxu0 %vm3127_vm0, %v3128_v4 }
 0x1e7   :  { %2742 = vmatprep.subr.bf16.mxu0 %v3126_v0 }
 0x1ea   :  { %2744 = vmatpush3.bf16.msra.mxu0 %v3190_v7 }
 0x1eb   :  { %2745 = vmatprep.subr.bf16.mxu0 %v3126_v0 }
 0x1ee   :  { %2747 = vmatpush3.bf16.msra.mxu0 %v3202_v10 }
 0x1ef   :  { %2748 = vmatprep.subr.bf16.mxu0 %v3126_v0 }
 0x1f2   :  { %2750 = vmatpush3.bf16.msra.mxu0 %v3214_v13 }
 0x1f3   :  { %2751 = vmatprep.subr.bf16.mxu0 %v3126_v0 }
 0x1f6   :  { %2753 = vmatpush3.bf16.msra.mxu0 %v3226_v16 }
 0x1f7   :  { %2754 = vmatprep.subr.bf16.mxu0 %v3126_v0 }
 0x1fa   :  { %2756 = vmatpush3.bf16.msra.mxu0 %v3238_v19 }
 0x1fb   :  { %2757 = vmatprep.subr.bf16.mxu0 %v3126_v0 }
 0x1fe   :  { %2759 = vmatpush3.bf16.msra.mxu0 %v3250_v22 }
 0x1ff   :  { %2760 = vmatprep.subr.bf16.mxu0 %v3126_v0 }
 0x202   :  { %2762 = vmatpush3.bf16.msra.mxu0 %v3262_v25 }
 0x203   :  { %2787 = vmatprep.subr.bf16.mxu0 %v3126_v0 }
 0x2b8   :  { %v292_v37 = vpop.f32.mrb[2].mxu0 }
 0x2b9   :  { %v296_v38 = vadd.f32 %v1677_v36, %v292_v37  ;;  %v2105_v39 = vpop.f32.mrb[3].mxu0  ;;  %v917_v36 = vld [vmem:[%s3779_s3 + $0x60] sm:$0xff]  ;;  %v918_v37 = vld [vmem:[%s3779_s3 + $0x68] sm:$0xff] }
 0x2ba   :  { %v919_v39 = vld [vmem:[%s3779_s3 + $0x70] sm:$0xff] }
 0x2bb   :  { %3098 = vtanh.f32 %v296_v38  ;;  %v3532_v38 = vpack.c.bf16 %v918_v37, %v917_v36  ;;  %v1566_v36 = vld [vmem:[%s3781_s5 + $0x30] sm:$0xff]  ;;  %v1567_v37 = vld [vmem:[%s3781_s5 + $0x38] sm:$0xff] }
 0x2c5   :  { %v3341_v40 = vpop.eup %3098 }
 0x2c6   :  { %2139 = vmatmul.mubr.f32.vlgmr.msra.gmra.mrb[2].mxu1 %v3341_v40 }
 0x2c7   :  { %2765 = vmatpush3.bf16.msra.mxu1 %v3181_v5  ;;  %2208 = vmatprep.mubr.msk.f32.mxu1 %vm3127_vm0, %v3128_v4 }
 0x2c8   :  { %2766 = vmatprep.subr.bf16.mxu1 %v3126_v0 }
 0x2cb   :  { %2768 = vmatpush3.bf16.msra.mxu1 %v3190_v7 }
 0x2cc   :  { %2769 = vmatprep.subr.bf16.mxu1 %v3126_v0 }
 0x2cf   :  { %2771 = vmatpush3.bf16.msra.mxu1 %v3202_v10 }
 0x2d0   :  { %2772 = vmatprep.subr.bf16.mxu1 %v3126_v0 }
 0x2d3   :  { %2774 = vmatpush3.bf16.msra.mxu1 %v3214_v13 }
 0x2d4   :  { %2775 = vmatprep.subr.bf16.mxu1 %v3126_v0 }
 0x2d7   :  { %2777 = vmatpush3.bf16.msra.mxu1 %v3226_v16 }
 0x2d8   :  { %2778 = vmatprep.subr.bf16.mxu1 %v3126_v0 }
 0x2db   :  { %2780 = vmatpush3.bf16.msra.mxu1 %v3238_v19 }
 0x2dc   :  { %2781 = vmatprep.subr.bf16.mxu1 %v3126_v0 }
 0x2df   :  { %2783 = vmatpush3.bf16.msra.mxu1 %v3250_v22 }
 0x2e0   :  { %2784 = vmatprep.subr.bf16.mxu1 %v3126_v0 }
 0x2e3   :  { %2786 = vmatpush3.bf16.msra.mxu1 %v3262_v25 }
 0x2e4   :  { %2811 = vmatprep.subr.bf16.mxu1 %v3126_v0 }
 0x399   :  { %v384_v42 = vpop.f32.mrb[2].mxu1 }
 0x39a   :  { %v388_v43 = vadd.f32 %v1678_v41, %v384_v42  ;;  %v2140_v44 = vpop.f32.mrb[3].mxu1  ;;  %v1681_v42 = vld [vmem:[%s3777_s0 + $0x30] sm:$0xff] }
 0x39c   :  { %3100 = vtanh.f32 %v388_v43 }
 0x3a6   :  { %v3365_v45 = vpop.eup %3100 }
 0x3a7   :  { %2174 = vmatmul.mubr.f32.vlgmr.msra.gmra.mrb[4].mxu0 %v3365_v45 }
 0x3a8   :  { %2789 = vmatpush3.bf16.msra.mxu0 %v3181_v5  ;;  %2243 = vmatprep.mubr.msk.f32.mxu0 %vm3127_vm0, %v3128_v4 }
 0x3a9   :  { %2790 = vmatprep.subr.bf16.mxu0 %v3126_v0 }
 0x3ac   :  { %2792 = vmatpush3.bf16.msra.mxu0 %v3190_v7 }
 0x3ad   :  { %2793 = vmatprep.subr.bf16.mxu0 %v3126_v0 }
 0x3b0   :  { %2795 = vmatpush3.bf16.msra.mxu0 %v3202_v10 }
 0x3b1   :  { %2796 = vmatprep.subr.bf16.mxu0 %v3126_v0 }
 0x3b4   :  { %2798 = vmatpush3.bf16.msra.mxu0 %v3214_v13 }
 0x3b5   :  { %2799 = vmatprep.subr.bf16.mxu0 %v3126_v0 }
 0x3b8   :  { %2801 = vmatpush3.bf16.msra.mxu0 %v3226_v16 }
 0x3b9   :  { %2802 = vmatprep.subr.bf16.mxu0 %v3126_v0 }
 0x3bc   :  { %2804 = vmatpush3.bf16.msra.mxu0 %v3238_v19 }
 0x3bd   :  { %2805 = vmatprep.subr.bf16.mxu0 %v3126_v0 }
 0x3c0   :  { %2807 = vmatpush3.bf16.msra.mxu0 %v3250_v22 }
 0x3c1   :  { %2808 = vmatprep.subr.bf16.mxu0 %v3126_v0 }
 0x3c4   :  { %2810 = vmatpush3.bf16.msra.mxu0 %v3262_v25 }
 0x3c5   :  { %2836 = vmatprep.subr.bf16.mxu0 %v2835_v53 }
 0x47a   :  { %v476_v47 = vpop.f32.mrb[4].mxu0 }
 0x47b   :  { %v480_v48 = vadd.f32 %v1679_v46, %v476_v47  ;;  %v2175_v49 = vpop.f32.mrb[5].mxu0 }
 0x47d   :  { %3102 = vtanh.f32 %v480_v48 }
 0x487   :  { %v3388_v50 = vpop.eup %3102 }
 0x488   :  { %2209 = vmatmul.mubr.f32.vlgmr.msra.gmra.mrb[4].mxu1 %v3388_v50 }
 0x489   :  { %2813 = vmatpush3.bf16.msra.mxu1 %v3181_v5  ;;  %2278 = vmatprep.mubr.msk.f32.mxu1 %vm3127_vm0, %v3128_v4  ;;  %v2847_v5 = vpack.c.bf16 %v775_v3, %v774_v2 }
 0x48a   :  { %2814 = vmatprep.subr.bf16.mxu1 %v3126_v0 }
 0x48d   :  { %2816 = vmatpush3.bf16.msra.mxu1 %v3190_v7  ;;  %v777_v7 = vld [vmem:[%s3778_s2 + $0x48] sm:$0xff] }
 0x48e   :  { %2817 = vmatprep.subr.bf16.mxu1 %v3126_v0  ;;  %v2851_v8 = vpack.c.bf16 %v777_v7, %v776_v6 }
 0x491   :  { %2819 = vmatpush3.bf16.msra.mxu1 %v3202_v10  ;;  %v779_v10 = vld [vmem:[%s3778_s2 + $0x58] sm:$0xff] }
 0x492   :  { %2820 = vmatprep.subr.bf16.mxu1 %v3126_v0  ;;  %v2855_v11 = vpack.c.bf16 %v779_v10, %v778_v9 }
 0x495   :  { %2822 = vmatpush3.bf16.msra.mxu1 %v3214_v13  ;;  %v781_v13 = vld [vmem:[%s3778_s2 + $0x68] sm:$0xff] }
 0x496   :  { %2823 = vmatprep.subr.bf16.mxu1 %v3126_v0  ;;  %v2859_v14 = vpack.c.bf16 %v781_v13, %v780_v12 }
 0x499   :  { %2825 = vmatpush3.bf16.msra.mxu1 %v3226_v16  ;;  %v783_v16 = vld [vmem:[%s3778_s2 + $0x78] sm:$0xff] }
 0x49a   :  { %2826 = vmatprep.subr.bf16.mxu1 %v3126_v0  ;;  %v2863_v17 = vpack.c.bf16 %v783_v16, %v782_v15 }
 0x49d   :  { %2828 = vmatpush3.bf16.msra.mxu1 %v3238_v19  ;;  %v906_v19 = vld [vmem:[%s3779_s3 + $0x8] sm:$0xff] }
 0x49e   :  { %2829 = vmatprep.subr.bf16.mxu1 %v3126_v0  ;;  %v3472_v20 = vpack.c.bf16 %v906_v19, %v905_v18 }
 0x4a1   :  { %2831 = vmatpush3.bf16.msra.mxu1 %v3250_v22  ;;  %v908_v22 = vld [vmem:[%s3779_s3 + $0x18] sm:$0xff] }
 0x4a2   :  { %2832 = vmatprep.subr.bf16.mxu1 %v3126_v0  ;;  %v3482_v23 = vpack.c.bf16 %v908_v22, %v907_v21 }
 0x4a5   :  { %2834 = vmatpush3.bf16.msra.mxu1 %v3262_v25  ;;  %v910_v25 = vld [vmem:[%s3779_s3 + $0x28] sm:$0xff] }
 0x4a6   :  { %2867 = vmatprep.subr.bf16.mxu1 %v3126_v0  ;;  %v3492_v26 = vpack.c.bf16 %v910_v25, %v909_v24 }
 0x55b   :  { %v568_v55 = vpop.f32.mrb[4].mxu1 }
 0x55c   :  { %v572_v56 = vadd.f32 %v1680_v54, %v568_v55  ;;  %v2210_v57 = vpop.f32.mrb[5].mxu1 }
 0x55e   :  { %3104 = vtanh.f32 %v572_v56 }
 0x568   :  { %v3105_v61 = vpop.eup %3104 }
 0x569   :  { %2244 = vmatmul.mubr.f32.vlgmr.msra.gmra.mrb[6].mxu0 %v3105_v61 }
 0x56a   :  { %2838 = vmatpush3.bf16.msra.mxu0 %v2835_v53  ;;  %2313 = vmatprep.mubr.f32.mxu0 %v3293_v30  ;;  %v913_v30 = vld [vmem:[%s3779_s3 + $0x40] sm:$0xff]  ;;  %v1682_v53 = vld [vmem:[%s3777_s0 + $0x38] sm:$0xff] }
 0x56b   :  { %2840 = vmatprep.subr.bf16.mxu0 %v2839_v60  ;;  %v3512_v32 = vpack.c.bf16 %v914_v31, %v913_v30  ;;  %v1563_v30 = vld [vmem:[%s3781_s5 + $0x18] sm:$0xff] }
 0x56e   :  { %2842 = vmatpush3.bf16.msra.mxu0 %v2839_v60 }
 0x56f   :  { %2844 = vmatprep.subr.bf16.mxu0 %v2843_v1 }
 0x572   :  { %2846 = vmatpush3.bf16.msra.mxu0 %v2843_v1 }
 0x573   :  { %2848 = vmatprep.subr.bf16.mxu0 %v2847_v5 }
 0x576   :  { %2850 = vmatpush3.bf16.msra.mxu0 %v2847_v5 }
 0x577   :  { %2852 = vmatprep.subr.bf16.mxu0 %v2851_v8 }
 0x57a   :  { %2854 = vmatpush3.bf16.msra.mxu0 %v2851_v8 }
 0x57b   :  { %2856 = vmatprep.subr.bf16.mxu0 %v2855_v11 }
 0x57e   :  { %2858 = vmatpush3.bf16.msra.mxu0 %v2855_v11 }
 0x57f   :  { %2860 = vmatprep.subr.bf16.mxu0 %v2859_v14 }
 0x582   :  { %2862 = vmatpush3.bf16.msra.mxu0 %v2859_v14 }
 0x583   :  { %2864 = vmatprep.subr.bf16.mxu0 %v2863_v17 }
 0x586   :  { %2866 = vmatpush3.bf16.msra.mxu0 %v2863_v17 }
 0x587   :  { %2891 = vmatprep.subr.bf16.mxu0 %v3126_v0 }
 0x589   :  { %2314 = vmatmul.mubr.f32.vlgmr.msra.gmra.mrb[8].mxu0 %v3317_v35  ;;  %v3522_v35 = vpack.c.bf16 %v916_v34, %v915_v33  ;;  %v1564_v33 = vld [vmem:[%s3781_s5 + $0x20] sm:$0xff]  ;;  %v1565_v34 = vld [vmem:[%s3781_s5 + $0x28] sm:$0xff] }
 0x58a   :  { %2316 = vmatprep.mubr.f32.mxu0 %v3341_v40  ;;  %2893 = vmatpush3.bf16.msra.mxu0 %v3472_v20  ;;  %v920_v40 = vld [vmem:[%s3779_s3 + $0x78] sm:$0xff] }
 0x58b   :  { %2894 = vmatprep.subr.bf16.mxu0 %v3126_v0  ;;  %v3542_v41 = vpack.c.bf16 %v920_v40, %v919_v39  ;;  %v1568_v39 = vld [vmem:[%s3781_s5 + $0x40] sm:$0xff]  ;;  %v1569_v40 = vld [vmem:[%s3781_s5 + $0x48] sm:$0xff] }
 0x58d   :  { %2317 = vmatmul.mubr.f32.gmra.mrb[10].mxu0 %v3365_v45 }
 0x58e   :  { %2319 = vmatprep.mubr.f32.mxu0 %v3388_v50  ;;  %2896 = vmatpush3.bf16.msra.mxu0 %v3482_v23 }
 0x58f   :  { %2897 = vmatprep.subr.bf16.mxu0 %v3126_v0 }
 0x591   :  { %2320 = vmatmul.mubr.f32.gmra.mrb[12].mxu0 %v3105_v61 }
 0x592   :  { %2899 = vmatpush3.bf16.msra.mxu0 %v3492_v26 }
 0x593   :  { %2900 = vmatprep.subr.bf16.mxu0 %v3126_v0 }
 0x596   :  { %2902 = vmatpush3.bf16.msra.mxu0 %v3502_v29 }
 0x597   :  { %2903 = vmatprep.subr.bf16.mxu0 %v3126_v0 }
 0x59a   :  { %2905 = vmatpush3.bf16.msra.mxu0 %v3512_v32 }
 0x59b   :  { %2906 = vmatprep.subr.bf16.mxu0 %v3126_v0 }
 0x59e   :  { %2908 = vmatpush3.bf16.msra.mxu0 %v3522_v35 }
 0x59f   :  { %2909 = vmatprep.subr.bf16.mxu0 %v3126_v0 }
 0x5a2   :  { %2911 = vmatpush3.bf16.msra.mxu0 %v3532_v38 }
 0x5a3   :  { %2912 = vmatprep.subr.bf16.mxu0 %v3126_v0 }
 0x5a6   :  { %2914 = vmatpush3.bf16.msra.mxu0 %v3542_v41 }
 0x5a7   :  { %2939 = vmatprep.subr.bf16.mxu0 %v3126_v0 }
 0x63c   :  { %v660_v43 = vpop.f32.mrb[6].mxu0 }
 0x63d   :  { %v664_v44 = vadd.f32 %v1681_v42, %v660_v43  ;;  %v2245_v45 = vpop.f32.mrb[7].mxu0  ;;  %v1570_v42 = vld [vmem:[%s3781_s5 + $0x50] sm:$0xff]  ;;  %v1571_v43 = vld [vmem:[%s3781_s5 + $0x58] sm:$0xff] }
 0x63e   :  { %v1572_v45 = vld [vmem:[%s3781_s5 + $0x60] sm:$0xff] }
 0x63f   :  { %3106 = vtanh.f32 %v664_v44  ;;  %v3079_v44 = vpack.c.bf16 %v1571_v43, %v1570_v42 }
 0x649   :  { %v3107_v46 = vpop.eup %3106 }
 0x64a   :  { %2279 = vmatmul.mubr.f32.vlgmr.msra.gmra.mrb[6].mxu1 %v3107_v46  ;;  %2322 = vmatprep.mubr.f32.mxu0 %v3107_v46  ;;  %v1573_v46 = vld [vmem:[%s3781_s5 + $0x68] sm:$0xff] }
 0x64b   :  { %2869 = vmatpush3.bf16.msra.mxu1 %v3472_v20  ;;  %2357 = vmatprep.mubr.msk.f32.mxu1 %vm3127_vm0, %v3128_v4 }
 0x64c   :  { %2870 = vmatprep.subr.bf16.mxu1 %v3126_v0 }
 0x64f   :  { %2872 = vmatpush3.bf16.msra.mxu1 %v3482_v23 }
 0x650   :  { %2873 = vmatprep.subr.bf16.mxu1 %v3126_v0 }
 0x653   :  { %2875 = vmatpush3.bf16.msra.mxu1 %v3492_v26 }
 0x654   :  { %2876 = vmatprep.subr.bf16.mxu1 %v3126_v0 }
 0x657   :  { %2878 = vmatpush3.bf16.msra.mxu1 %v3502_v29 }
 0x658   :  { %2879 = vmatprep.subr.bf16.mxu1 %v3126_v0 }
 0x65b   :  { %2881 = vmatpush3.bf16.msra.mxu1 %v3512_v32 }
 0x65c   :  { %v3560_v47 = vpop.f32.mrb[8].mxu0  ;;  %2882 = vmatprep.subr.bf16.mxu1 %v3126_v0 }
 0x65d   :  { %v857_v48 = vpop.f32.mrb[9].mxu0  ;;  %v863_v3 = vadd.f32 %v3560_v47, %v3604_v58  ;;  %v3083_v47 = vpack.c.bf16 %v1573_v46, %v1572_v45 }
 0x65e   :  { %v858_v59 = vadd.f32 %v3604_v58, %v857_v48  ;;  %v1574_v48 = vld [vmem:[%s3781_s5 + $0x70] sm:$0xff] }
 0x65f   :  { %2884 = vmatpush3.bf16.msra.mxu1 %v3522_v35 }
 0x660   :  { %v3564_v49 = vpop.f32.mrb[10].mxu0  ;;  %2885 = vmatprep.subr.bf16.mxu1 %v3126_v0 }
 0x661   :  { %v3567_v50 = vpop.f32.mrb[11].mxu0  ;;  %v873_v14 = vadd.f32 %v3564_v49, %v3604_v58  ;;  %v1575_v49 = vld [vmem:[%s3781_s5 + $0x78] sm:$0xff] }
 0x662   :  { %v868_v9 = vadd.f32 %v3604_v58, %v3567_v50  ;;  %v3087_v50 = vpack.c.bf16 %v1575_v49, %v1574_v48 }
 0x663   :  { %2887 = vmatpush3.bf16.msra.mxu1 %v3532_v38 }
 0x664   :  { %v3570_v51 = vpop.f32.mrb[12].mxu0  ;;  %2888 = vmatprep.subr.bf16.mxu1 %v3126_v0 }
 0x665   :  { %v3573_v52 = vpop.f32.mrb[13].mxu0 }
 0x666   :  { %v878_v19 = vadd.f32 %v3604_v58, %v3573_v52 }
 0x667   :  { %2890 = vmatpush3.bf16.msra.mxu1 %v3542_v41 }
 0x668   :  { %2915 = vmatprep.subr.bf16.mxu1 %v3126_v0 }
 0x66a   :  { %2358 = vmatmul.mubr.f32.vlgmr.msra.gmra.mrb[8].mxu1 %v3128_v4 }
 0x66b   :  { %2917 = vmatpush3.bf16.msra.mxu1 %v3472_v20  ;;  %2427 = vmatprep.mubr.msk.f32.mxu1 %vm3127_vm0, %v3128_v4 }
 0x66c   :  { %2918 = vmatprep.subr.bf16.mxu1 %v3126_v0 }
 0x66f   :  { %2920 = vmatpush3.bf16.msra.mxu1 %v3482_v23 }
 0x670   :  { %2921 = vmatprep.subr.bf16.mxu1 %v3126_v0 }
 0x673   :  { %2923 = vmatpush3.bf16.msra.mxu1 %v3492_v26 }
 0x674   :  { %2924 = vmatprep.subr.bf16.mxu1 %v3126_v0 }
 0x677   :  { %2926 = vmatpush3.bf16.msra.mxu1 %v3502_v29 }
 0x678   :  { %2927 = vmatprep.subr.bf16.mxu1 %v3126_v0 }
 0x67b   :  { %2929 = vmatpush3.bf16.msra.mxu1 %v3512_v32 }
 0x67c   :  { %2930 = vmatprep.subr.bf16.mxu1 %v3126_v0 }
 0x67f   :  { %2932 = vmatpush3.bf16.msra.mxu1 %v3522_v35 }
 0x680   :  { %2933 = vmatprep.subr.bf16.mxu1 %v3126_v0 }
 0x683   :  { %2935 = vmatpush3.bf16.msra.mxu1 %v3532_v38 }
 0x684   :  { %2936 = vmatprep.subr.bf16.mxu1 %v3126_v0 }
 0x687   :  { %2938 = vmatpush3.bf16.msra.mxu1 %v3542_v41 }
 0x688   :  { %2963 = vmatprep.subr.bf16.mxu1 %v3126_v0 }
 0x71d   :  { %v752_v54 = vpop.f32.mrb[6].mxu1 }
 0x71e   :  { %v756_v55 = vadd.f32 %v1682_v53, %v752_v54  ;;  %v2280_v56 = vpop.f32.mrb[7].mxu1 }
 0x71f   :  { %v1684_v56 = vld [vmem:[%s3782_s6] ss:$0 sm:$0xff] }
 0x720   :  { %3108 = vtanh.f32 %v756_v55 }
 0x72a   :  { %v3109_v57 = vpop.eup %3108 }
 0x72b   :  { %2323 = vmatmul.mubr.f32.gmra.mrb[14].mxu0 %v3109_v57 }
 0x72c   :  { %2392 = vmatprep.mubr.msk.f32.mxu0 %vm3127_vm0, %v3128_v4 }
 0x73d   :  { %v987_v60 = vpop.f32.mrb[8].mxu1 }
 0x73e   :  { %v991_v61 = vadd.f32 %v987_v60, %v858_v59  ;;  %v2359_v62 = vpop.f32.mrb[9].mxu1 }
 0x740   :  { %3110 = vtanh.f32 %v991_v61 }
 0x74a   :  { %v3111_v63 = vpop.eup %3110 }
 0x74b   :  { %2393 = vmatmul.mubr.f32.vlgmr.msra.gmra.mrb[16].mxu0 %v3111_v63 }
 0x74c   :  { %2941 = vmatpush3.bf16.msra.mxu0 %v3472_v20  ;;  %2462 = vmatprep.mubr.msk.f32.mxu0 %vm3127_vm0, %v3128_v4 }
 0x74d   :  { %2942 = vmatprep.subr.bf16.mxu0 %v3126_v0 }
 0x750   :  { %2944 = vmatpush3.bf16.msra.mxu0 %v3482_v23 }
 0x751   :  { %2945 = vmatprep.subr.bf16.mxu0 %v3126_v0 }
 0x754   :  { %2947 = vmatpush3.bf16.msra.mxu0 %v3492_v26 }
 0x755   :  { %2948 = vmatprep.subr.bf16.mxu0 %v3126_v0 }
 0x758   :  { %2950 = vmatpush3.bf16.msra.mxu0 %v3502_v29 }
 0x759   :  { %2951 = vmatprep.subr.bf16.mxu0 %v3126_v0 }
 0x75c   :  { %2953 = vmatpush3.bf16.msra.mxu0 %v3512_v32 }
 0x75d   :  { %2954 = vmatprep.subr.bf16.mxu0 %v3126_v0 }
 0x760   :  { %2956 = vmatpush3.bf16.msra.mxu0 %v3522_v35 }
 0x761   :  { %2957 = vmatprep.subr.bf16.mxu0 %v3126_v0 }
 0x764   :  { %2959 = vmatpush3.bf16.msra.mxu0 %v3532_v38 }
 0x765   :  { %2960 = vmatprep.subr.bf16.mxu0 %v3126_v0 }
 0x768   :  { %2962 = vmatpush3.bf16.msra.mxu0 %v3542_v41 }
 0x769   :  { %2987 = vmatprep.subr.bf16.mxu0 %v3126_v0 }
 0x7fe   :  { %v3625_v1 = vpop.f32.mrb[14].mxu0 }
 0x7ff   :  { %v3627_v2 = vpop.f32.mrb[15].mxu0  ;;  %v893_v62 = vadd.f32 %v3625_v1, %v3604_v58 }
 0x81e   :  { %v1060_v5 = vpop.f32.mrb[16].mxu0 }
 0x81f   :  { %v1064_v6 = vadd.f32 %v1060_v5, %v863_v3  ;;  %v2394_v7 = vpop.f32.mrb[17].mxu0 }
 0x821   :  { %3112 = vtanh.f32 %v1064_v6 }
 0x82b   :  { %v3113_v8 = vpop.eup %3112 }
 0x82c   :  { %2428 = vmatmul.mubr.f32.vlgmr.msra.gmra.mrb[10].mxu1 %v3113_v8 }
 0x82d   :  { %2965 = vmatpush3.bf16.msra.mxu1 %v3472_v20  ;;  %2497 = vmatprep.mubr.msk.f32.mxu1 %vm3127_vm0, %v3128_v4 }
 0x82e   :  { %2966 = vmatprep.subr.bf16.mxu1 %v3126_v0 }
 0x831   :  { %2968 = vmatpush3.bf16.msra.mxu1 %v3482_v23 }
 0x832   :  { %2969 = vmatprep.subr.bf16.mxu1 %v3126_v0 }
 0x835   :  { %2971 = vmatpush3.bf16.msra.mxu1 %v3492_v26 }
 0x836   :  { %2972 = vmatprep.subr.bf16.mxu1 %v3126_v0 }
 0x839   :  { %2974 = vmatpush3.bf16.msra.mxu1 %v3502_v29 }
 0x83a   :  { %2975 = vmatprep.subr.bf16.mxu1 %v3126_v0 }
 0x83d   :  { %2977 = vmatpush3.bf16.msra.mxu1 %v3512_v32 }
 0x83e   :  { %2978 = vmatprep.subr.bf16.mxu1 %v3126_v0 }
 0x841   :  { %2980 = vmatpush3.bf16.msra.mxu1 %v3522_v35 }
 0x842   :  { %2981 = vmatprep.subr.bf16.mxu1 %v3126_v0 }
 0x845   :  { %2983 = vmatpush3.bf16.msra.mxu1 %v3532_v38 }
 0x846   :  { %2984 = vmatprep.subr.bf16.mxu1 %v3126_v0 }
 0x849   :  { %2986 = vmatpush3.bf16.msra.mxu1 %v3542_v41 }
 0x84a   :  { %3011 = vmatprep.subr.bf16.mxu1 %v3126_v0 }
 0x8ff   :  { %v1133_v10 = vpop.f32.mrb[10].mxu1 }
 0x900   :  { %v1137_v11 = vadd.f32 %v1133_v10, %v868_v9  ;;  %v2429_v12 = vpop.f32.mrb[11].mxu1 }
 0x902   :  { %3114 = vtanh.f32 %v1137_v11 }
 0x90c   :  { %v3115_v13 = vpop.eup %3114 }
 0x90d   :  { %2463 = vmatmul.mubr.f32.vlgmr.msra.gmra.mrb[18].mxu0 %v3115_v13 }
 0x90e   :  { %2989 = vmatpush3.bf16.msra.mxu0 %v3472_v20  ;;  %2532 = vmatprep.mubr.msk.f32.mxu0 %vm3127_vm0, %v3128_v4 }
 0x90f   :  { %2990 = vmatprep.subr.bf16.mxu0 %v3126_v0 }
 0x912   :  { %2992 = vmatpush3.bf16.msra.mxu0 %v3482_v23 }
 0x913   :  { %2993 = vmatprep.subr.bf16.mxu0 %v3126_v0 }
 0x916   :  { %2995 = vmatpush3.bf16.msra.mxu0 %v3492_v26 }
 0x917   :  { %2996 = vmatprep.subr.bf16.mxu0 %v3126_v0 }
 0x91a   :  { %2998 = vmatpush3.bf16.msra.mxu0 %v3502_v29 }
 0x91b   :  { %2999 = vmatprep.subr.bf16.mxu0 %v3126_v0 }
 0x91e   :  { %3001 = vmatpush3.bf16.msra.mxu0 %v3512_v32 }
 0x91f   :  { %3002 = vmatprep.subr.bf16.mxu0 %v3126_v0 }
 0x922   :  { %3004 = vmatpush3.bf16.msra.mxu0 %v3522_v35 }
 0x923   :  { %3005 = vmatprep.subr.bf16.mxu0 %v3126_v0 }
 0x926   :  { %3007 = vmatpush3.bf16.msra.mxu0 %v3532_v38 }
 0x927   :  { %3008 = vmatprep.subr.bf16.mxu0 %v3126_v0 }
 0x92a   :  { %3010 = vmatpush3.bf16.msra.mxu0 %v3542_v41 }
 0x92b   :  { %3035 = vmatprep.subr.bf16.mxu0 %v3126_v0 }
 0x9e0   :  { %v1206_v15 = vpop.f32.mrb[18].mxu0 }
 0x9e1   :  { %v1210_v16 = vadd.f32 %v1206_v15, %v873_v14  ;;  %v2464_v17 = vpop.f32.mrb[19].mxu0 }
 0x9e3   :  { %3116 = vtanh.f32 %v1210_v16 }
 0x9ed   :  { %v3117_v18 = vpop.eup %3116 }
 0x9ee   :  { %2498 = vmatmul.mubr.f32.vlgmr.msra.gmra.mrb[12].mxu1 %v3117_v18 }
 0x9ef   :  { %3013 = vmatpush3.bf16.msra.mxu1 %v3472_v20  ;;  %2567 = vmatprep.mubr.msk.f32.mxu1 %vm3127_vm0, %v3128_v4 }
 0x9f0   :  { %3014 = vmatprep.subr.bf16.mxu1 %v3126_v0 }
 0x9f3   :  { %3016 = vmatpush3.bf16.msra.mxu1 %v3482_v23 }
 0x9f4   :  { %3017 = vmatprep.subr.bf16.mxu1 %v3126_v0 }
 0x9f7   :  { %3019 = vmatpush3.bf16.msra.mxu1 %v3492_v26 }
 0x9f8   :  { %3020 = vmatprep.subr.bf16.mxu1 %v3126_v0 }
 0x9fb   :  { %3022 = vmatpush3.bf16.msra.mxu1 %v3502_v29 }
 0x9fc   :  { %3023 = vmatprep.subr.bf16.mxu1 %v3126_v0 }
 0x9ff   :  { %3025 = vmatpush3.bf16.msra.mxu1 %v3512_v32 }
 0xa00   :  { %3026 = vmatprep.subr.bf16.mxu1 %v3126_v0 }
 0xa03   :  { %3028 = vmatpush3.bf16.msra.mxu1 %v3522_v35 }
 0xa04   :  { %3029 = vmatprep.subr.bf16.mxu1 %v3126_v0 }
 0xa07   :  { %3031 = vmatpush3.bf16.msra.mxu1 %v3532_v38 }
 0xa08   :  { %3032 = vmatprep.subr.bf16.mxu1 %v3126_v0 }
 0xa0b   :  { %3034 = vmatpush3.bf16.msra.mxu1 %v3542_v41 }
 0xac1   :  { %v1279_v21 = vpop.f32.mrb[12].mxu1 }
 0xac2   :  { %v1283_v22 = vadd.f32 %v1279_v21, %v878_v19  ;;  %v2499_v24 = vpop.f32.mrb[13].mxu1 }
 0xac4   :  { %3118 = vtanh.f32 %v1283_v22 }
 0xace   :  { %v3119_v25 = vpop.eup %3118 }
 0xacf   :  { %2533 = vmatmul.mubr.f32.vlgmr.msra.gmra.mrb[20].mxu0 %v3119_v25 }
 0xad0   :  { %3037 = vmatpush3.bf16.msra.mxu0 %v3472_v20  ;;  %2602 = vmatprep.mubr.msk.f32.mxu0 %vm3127_vm0, %v3128_v4  ;;  %v1560_v4 = vld [vmem:[%s3781_s5] sm:$0xff]  ;;  %v1561_v20 = vld [vmem:[%s3781_s5 + $0x8] sm:$0xff] }
 0xad1   :  { %3038 = vmatprep.subr.bf16.mxu0 %v3126_v0 }
 0xad4   :  { %3040 = vmatpush3.bf16.msra.mxu0 %v3482_v23  ;;  %v3059_v23 = vpack.c.bf16 %v1561_v20, %v1560_v4 }
 0xad5   :  { %3041 = vmatprep.subr.bf16.mxu0 %v3126_v0 }
 0xad6   :  { %3060 = vmatprep.subr.bf16.mxu1 %v3059_v23 }
 0xad8   :  { %3043 = vmatpush3.bf16.msra.mxu0 %v3492_v26  ;;  %v883_v26 = vadd.f32 %v3570_v51, %v3604_v58  ;;  %v888_v51 = vadd.f32 %v3604_v58, %v3627_v2 }
 0xad9   :  { %3044 = vmatprep.subr.bf16.mxu0 %v3126_v0 }
 0xadc   :  { %3046 = vmatpush3.bf16.msra.mxu0 %v3502_v29 }
 0xadd   :  { %3047 = vmatprep.subr.bf16.mxu0 %v3126_v0 }
 0xae0   :  { %3049 = vmatpush3.bf16.msra.mxu0 %v3512_v32 }
 0xae1   :  { %3050 = vmatprep.subr.bf16.mxu0 %v3126_v0 }
 0xae4   :  { %3052 = vmatpush3.bf16.msra.mxu0 %v3522_v35  ;;  %v3067_v35 = vpack.c.bf16 %v1565_v34, %v1564_v33 }
 0xae5   :  { %3053 = vmatprep.subr.bf16.mxu0 %v3126_v0 }
 0xae8   :  { %3055 = vmatpush3.bf16.msra.mxu0 %v3532_v38  ;;  %v3071_v38 = vpack.c.bf16 %v1567_v37, %v1566_v36 }
 0xae9   :  { %3056 = vmatprep.subr.bf16.mxu0 %v3126_v0  ;;  %v1562_v0 = vld [vmem:[%s3781_s5 + $0x10] sm:$0xff] }
 0xaea   :  { %v3063_v31 = vpack.c.bf16 %v1563_v30, %v1562_v0 }
 0xaec   :  { %3058 = vmatpush3.bf16.msra.mxu0 %v3542_v41  ;;  %v3075_v41 = vpack.c.bf16 %v1569_v40, %v1568_v39 }
 0xba2   :  { %v1369_v27 = vpop.f32.mrb[20].mxu0 }
 0xba3   :  { %v1373_v28 = vadd.f32 %v1369_v27, %v883_v26  ;;  %v2534_v29 = vpop.f32.mrb[21].mxu0 }
 0xba5   :  { %3120 = vtanh.f32 %v1373_v28 }
 0xbaf   :  { %v3121_v32 = vpop.eup %3120 }
 0xbb0   :  { %2568 = vmatmul.mubr.f32.vlgmr.msra.gmra.mrb[14].mxu1 %v3121_v32 }
 0xbb1   :  { %3062 = vmatpush3.bf16.msra.mxu1 %v3059_v23  ;;  %2637 = vmatprep.mubr.f32.mxu1 %v3119_v25 }
 0xbb2   :  { %3064 = vmatprep.subr.bf16.mxu1 %v3063_v31 }
 0xbb5   :  { %3066 = vmatpush3.bf16.msra.mxu1 %v3063_v31 }
 0xbb6   :  { %3068 = vmatprep.subr.bf16.mxu1 %v3067_v35 }
 0xbb9   :  { %3070 = vmatpush3.bf16.msra.mxu1 %v3067_v35 }
 0xbba   :  { %3072 = vmatprep.subr.bf16.mxu1 %v3071_v38 }
 0xbbd   :  { %3074 = vmatpush3.bf16.msra.mxu1 %v3071_v38 }
 0xbbe   :  { %3076 = vmatprep.subr.bf16.mxu1 %v3075_v41 }
 0xbc1   :  { %3078 = vmatpush3.bf16.msra.mxu1 %v3075_v41 }
 0xbc2   :  { %3080 = vmatprep.subr.bf16.mxu1 %v3079_v44 }
 0xbc5   :  { %3082 = vmatpush3.bf16.msra.mxu1 %v3079_v44 }
 0xbc6   :  { %3084 = vmatprep.subr.bf16.mxu1 %v3083_v47 }
 0xbc9   :  { %3086 = vmatpush3.bf16.msra.mxu1 %v3083_v47 }
 0xbca   :  { %3088 = vmatprep.subr.bf16.mxu1 %v3087_v50 }
 0xbcd   :  { %3090 = vmatpush3.bf16.msra.mxu1 %v3087_v50 }
 0xbd0   :  { %2638 = vmatmul.mubr.f32.vlgmr.msra.gmra.mrb[16].mxu1 %v3121_v32 }
 0xc83   :  { %v1459_v52 = vpop.f32.mrb[14].mxu1 }
 0xc84   :  { %v1463_v53 = vadd.f32 %v1459_v52, %v888_v51  ;;  %v2569_v54 = vpop.f32.mrb[15].mxu1 }
 0xc86   :  { %3122 = vtanh.f32 %v1463_v53 }
 0xc90   :  { %v3123_v55 = vpop.eup %3122 }
 0xc91   :  { %2603 = vmatmul.mubr.f32.vlgmr.msra.gmra.mrb[22].mxu0 %v3123_v55  ;;  %2640 = vmatprep.mubr.f32.mxu1 %v3123_v55 }
 0xca3   :  { %v2639_v57 = vpop.f32.mrb[16].mxu1 }
 0xca4   :  { %v1655_v59 = vadd.f32 %v2639_v57, %v1684_v56  ;;  %v1649_v60 = vpop.f32.mrb[17].mxu1 }
 0xca5   :  { %v1650_v61 = vadd.f32 %v1684_v56, %v1649_v60 }
 0xca6   :  { %1669 = vst [vmem:[%s3783_s7 + $0x8] sm:$0xff] %v1655_v59 }
 0xca7   :  { %1668 = vst [vmem:[%s3783_s7] sm:$0xff] %v1650_v61 }
 0xd64   :  { %v1549_v63 = vpop.f32.mrb[22].mxu0 }
 0xd65   :  { %v1553_v2 = vadd.f32 %v1549_v63, %v893_v62  ;;  %v2604_v3 = vpop.f32.mrb[23].mxu0 }
 0xd67   :  { %3124 = vtanh.f32 %v1553_v2 }
 0xd71   :  { %v3125_v5 = vpop.eup %3124 }
 0xd72   :  { %2641 = vmatmul.mubr.f32.gmra.mrb[18].mxu1 %v3125_v5 }
 0xe45   :  { %v2642_v6 = vpop.f32.mrb[18].mxu1 }
 0xe46   :  { %v1665_v7 = vadd.f32 %v2642_v6, %v1684_v56  ;;  %v1659_v8 = vpop.f32.mrb[19].mxu1 }
 0xe47   :  { %v1660_v9 = vadd.f32 %v1684_v56, %v1659_v8 }
 0xe48   :  { %1671 = vst [vmem:[%s3783_s7 + $0x18] sm:$0xff] %v1665_v7 }
 0xe49   :  { %1670 = vst [vmem:[%s3783_s7 + $0x10] sm:$0xff] %v1660_v9 }

</bundles_post_ra>
